<compile_context>
chip_gen: v7x
topology: tpu7x:2x2x1
jax: 0.10.0
libtpu: 0.0.40
codegen_flags: <defaults>
</compile_context>

<pallas_src>
import jax
import jax.numpy as jnp
from jax.experimental import pallas as pl
from jax.experimental.pallas import tpu as pltpu

HIDDEN_SIZE = 32
OUTPUT_SIZE = 64
PADDED_VOCAB = 128          # vocab padded to a full 128-lane register
NEG_INF = -1e30             # padding bias -> exp() underflows to exactly 0
                            # (keep in f32; would overflow to -inf in bf16)


def fused_decoder_kernel(tok_ref,               # SMEM (T,) int32 (scalar prefetch)
                         gi_tab_ref,            # (V, 3H) = relu(E) @ W_ih + b_ih
                         h0_ref,                # (1, H)  initial hidden state
                         whh_ref,               # (H, 3H) GRU hidden weights (transposed, [r|z|n])
                         bhh_ref,               # (1, 3H) GRU hidden bias
                         wout_ref,              # (H, Vp) out Linear weight (transposed, zero-padded)
                         bout_ref,              # (1, Vp) out Linear bias (pad lanes = -1e30)
                         logp_ref,              # out (T, Vp) log-softmax rows (VMEM-resident)
                         hout_ref):             # out (1, H)  final hidden state
    H = h0_ref.shape[1]
    T = logp_ref.shape[0]

    def step(t, h):
        # embedding -> relu -> x @ W_ih + b_ih, all folded into one table row
        # load (dynamic sublane index; tokens are clamped in the wrapper).
        tok = tok_ref[t]
        gi = gi_tab_ref[pl.ds(tok, 1), :]                          # (1, 3H)

        # GRU gate pre-activations (PyTorch gate order: reset, update, new).
        gh = jnp.dot(h, whh_ref[...],
                     preferred_element_type=jnp.float32) + bhh_ref[...]

        # One sigmoid pass over the combined [r|z] 2H lanes, then split.
        rz = jax.nn.sigmoid(gi[:, :2 * H] + gh[:, :2 * H])
        r = rz[:, :H]
        z = rz[:, H:2 * H]
        n = jnp.tanh(gi[:, 2 * H:] + r * gh[:, 2 * H:])
        h_new = (1.0 - z) * n + z * h

        # self.out(output[0]) followed by LogSoftmax(dim=1).  Padded lanes
        # carry bias -1e30 -> exp underflows to 0, so the 128-lane
        # log-softmax equals the 64-lane one on the real vocab entries.
        logits = (jnp.dot(h_new, wout_ref[...],
                          preferred_element_type=jnp.float32) + bout_ref[...])
        m = jnp.max(logits, axis=1, keepdims=True)
        shifted = logits - m
        logp = shifted - jnp.log(jnp.sum(jnp.exp(shifted), axis=1,
                                         keepdims=True))

        logp_ref[pl.ds(t, 1), :] = logp
        return h_new

    # Whole decode loop inside the kernel; h lives in vregs as the carry.
    h_final = jax.lax.fori_loop(0, T, step, h0_ref[...], unroll=True)
    hout_ref[...] = h_final


def init_params(key, hidden_size, output_size):
    """Deterministic PyTorch-style uniform(-1/sqrt(H), 1/sqrt(H)) init."""
    ks = jax.random.split(key, 8)
    bound = 1.0 / jnp.sqrt(jnp.float32(hidden_size))

    def u(k, shape):
        return jax.random.uniform(k, shape, jnp.float32, -bound, bound)

    return {
        "embedding": u(ks[0], (output_size, hidden_size)),
        # GRU weights stored transposed: (in, 3*H), gate order [r|z|n].
        "w_ih_t": u(ks[1], (hidden_size, 3 * hidden_size)),
        "w_hh_t": u(ks[2], (hidden_size, 3 * hidden_size)),
        "b_ih": u(ks[3], (1, 3 * hidden_size)),
        "b_hh": u(ks[4], (1, 3 * hidden_size)),
        # Linear out stored transposed: (H, V).
        "w_out_t": u(ks[5], (hidden_size, output_size)),
        "b_out": u(ks[6], (1, output_size)),
    }


def decoder_rnn_decode(tokens, hidden, params):
    """Fused T-step decode == T sequential applications of DecoderRNN.forward.

    tokens : (T,) int32 token ids
    hidden : (1, 1, H) float32 initial hidden state
    returns (log_probs (T, V), final_hidden (1, 1, H))
    """
    T = int(tokens.shape[0])
    H, V, Vp = HIDDEN_SIZE, OUTPUT_SIZE, PADDED_VOCAB
    h0 = hidden.reshape(1, H)

    # Clamp token ids: the kernel does a dynamic row load with no OOB check.
    tokens = jnp.clip(jnp.asarray(tokens, jnp.int32), 0, V - 1)

    # Precompute relu(E) @ W_ih + b_ih once (exact: relu is row-wise, so
    # relu(E[tok]) @ W + b == (relu(E) @ W + b)[tok]).
    gi_tab = (jnp.maximum(params["embedding"], 0.0) @ params["w_ih_t"]
              + params["b_ih"])                                     # (V, 3H)

    # Lane-dense output projection: pad vocab 64 -> 128 (zeros in W, -1e30 in b).
    w_out_p = jnp.pad(params["w_out_t"], ((0, 0), (0, Vp - V)))
    b_out_p = jnp.pad(params["b_out"], ((0, 0), (0, Vp - V)),
                      constant_values=NEG_INF)

    operands = (gi_tab, h0, params["w_hh_t"], params["b_hh"],
                w_out_p, b_out_p)

    # Single grid step: every operand is DMA'd to VMEM exactly once.
    in_specs = [pl.BlockSpec(a.shape, lambda i, tok: (0, 0)) for a in operands]
    out_specs = (pl.BlockSpec((T, Vp), lambda i, tok: (0, 0)),   # resident logp buffer
                 pl.BlockSpec((1, H), lambda i, tok: (0, 0)))    # final hidden

    logp_p, h_final = pl.pallas_call(
        fused_decoder_kernel,
        grid_spec=pltpu.PrefetchScalarGridSpec(
            num_scalar_prefetch=1,     # tokens -> SMEM
            grid=(1,),
            in_specs=in_specs,
            out_specs=out_specs,
        ),
        out_shape=(jax.ShapeDtypeStruct((T, Vp), jnp.float32),
                   jax.ShapeDtypeStruct((1, H), jnp.float32)),
        compiler_params=pltpu.CompilerParams(
            dimension_semantics=("arbitrary",)),   # sequential recurrence
    )(tokens, *operands)

    return logp_p[:, :V], h_final.reshape(1, 1, H)


def decoder_rnn_forward(token, hidden, params):
    """Single-step API identical to DecoderRNN.forward(input, hidden)."""
    tokens = jnp.asarray(token, jnp.int32).reshape(1)
    logp, h_new = decoder_rnn_decode(tokens, hidden, params)
    return logp, h_new          # (1, V), (1, 1, H)


def reference_decode(tokens, h0, params):
    """Pure-JAX reference (same math, no Pallas) for correctness checking."""
    H = HIDDEN_SIZE

    def step(h, tok):
        x = jnp.maximum(params["embedding"][tok], 0.0).reshape(1, H)
        gi = x @ params["w_ih_t"] + params["b_ih"]
        gh = h @ params["w_hh_t"] + params["b_hh"]
        r = jax.nn.sigmoid(gi[:, 0:H] + gh[:, 0:H])
        z = jax.nn.sigmoid(gi[:, H:2 * H] + gh[:, H:2 * H])
        n = jnp.tanh(gi[:, 2 * H:3 * H] + r * gh[:, 2 * H:3 * H])
        h_new = (1.0 - z) * n + z * h
        logits = h_new @ params["w_out_t"] + params["b_out"]
        return h_new, jax.nn.log_softmax(logits, axis=1)[0]

    h_final, logps = jax.lax.scan(step, h0, tokens)
    return logps, h_final


if __name__ == "__main__":
    key = jax.random.PRNGKey(0)
    pkey, tkey = jax.random.split(key)

    params = init_params(pkey, HIDDEN_SIZE, OUTPUT_SIZE)

    T = 8
    tokens = jax.random.randint(tkey, (T,), 0, OUTPUT_SIZE, dtype=jnp.int32)
    hidden0 = jnp.zeros((1, 1, HIDDEN_SIZE), dtype=jnp.float32)

    # Fused T-step decode in a single pallas_call / single grid step.
    decode = jax.jit(decoder_rnn_decode)
    log_probs_seq, hidden_T = decode(tokens, hidden0, params)
    jax.block_until_ready((log_probs_seq, hidden_T))
    assert log_probs_seq.shape == (T, OUTPUT_SIZE)
    assert hidden_T.shape == (1, 1, HIDDEN_SIZE)

    # Single-step call with the original module's signature / shapes.
    log_probs, new_hidden = decoder_rnn_forward(tokens[0], hidden0, params)
    jax.block_until_ready((log_probs, new_hidden))
    assert log_probs.shape == (1, OUTPUT_SIZE)
    assert new_hidden.shape == (1, 1, HIDDEN_SIZE)

    # Numerical check against a pure-JAX reference of the same recurrence.
    ref_logps, ref_h = reference_decode(tokens,
                                        hidden0.reshape(1, HIDDEN_SIZE), params)
    assert bool(jnp.allclose(log_probs_seq, ref_logps, rtol=1e-4, atol=1e-4))
    assert bool(jnp.allclose(hidden_T.reshape(1, HIDDEN_SIZE), ref_h,
                             rtol=1e-4, atol=1e-4))
    assert bool(jnp.allclose(log_probs, ref_logps[0:1], rtol=1e-4, atol=1e-4))

    print("KERNEL_OK")
</pallas_src>

<mosaic_0001>
module attributes {stable_mosaic.version = 11 : i64} {
  func.func @fused_decoder_kernel(%arg0: i32, %arg1: memref<8xi32, #tpu.memory_space<smem>>, %arg2: memref<64x96xf32, #tpu.memory_space<vmem>>, %arg3: memref<1x32xf32, #tpu.memory_space<vmem>>, %arg4: memref<32x96xf32, #tpu.memory_space<vmem>>, %arg5: memref<1x96xf32, #tpu.memory_space<vmem>>, %arg6: memref<32x128xf32, #tpu.memory_space<vmem>>, %arg7: memref<1x128xf32, #tpu.memory_space<vmem>>, %arg8: memref<8x128xf32, #tpu.memory_space<vmem>>, %arg9: memref<1x32xf32, #tpu.memory_space<vmem>>) attributes {dimension_semantics = [#tpu.dimension_semantics<arbitrary>], iteration_bounds = array<i64: 1>, scalar_prefetch = 1 : i64, scratch_operands = 0 : i64, tpu.core_type = #tpu.core_type<tc>, window_params = [{pipeline_mode = #tpu.pipeline_mode<synchronous>, transform_indices = @transform_0, window_bounds = array<i64: 64, 96>}, {pipeline_mode = #tpu.pipeline_mode<synchronous>, transform_indices = @transform_1, window_bounds = array<i64: 1, 32>}, {pipeline_mode = #tpu.pipeline_mode<synchronous>, transform_indices = @transform_2, window_bounds = array<i64: 32, 96>}, {pipeline_mode = #tpu.pipeline_mode<synchronous>, transform_indices = @transform_3, window_bounds = array<i64: 1, 96>}, {pipeline_mode = #tpu.pipeline_mode<synchronous>, transform_indices = @transform_4, window_bounds = array<i64: 32, 128>}, {pipeline_mode = #tpu.pipeline_mode<synchronous>, transform_indices = @transform_5, window_bounds = array<i64: 1, 128>}, {pipeline_mode = #tpu.pipeline_mode<synchronous>, transform_indices = @transform_6, window_bounds = array<i64: 8, 128>}, {pipeline_mode = #tpu.pipeline_mode<synchronous>, transform_indices = @transform_7, window_bounds = array<i64: 1, 32>}]} {
    %c0 = arith.constant 0 : index
    %c0_0 = arith.constant 0 : index
    %0 = vector.load %arg3[%c0, %c0_0] : memref<1x32xf32, #tpu.memory_space<vmem>>, vector<1x32xf32>
    %c0_i32 = arith.constant 0 : i32
    %1 = arith.index_cast %c0_i32 : i32 to index
    %2 = memref.load %arg1[%1] : memref<8xi32, #tpu.memory_space<smem>>
    %3 = arith.index_cast %2 : i32 to index
    %c0_1 = arith.constant 0 : index
    %4 = vector.load %arg2[%3, %c0_1] : memref<64x96xf32, #tpu.memory_space<vmem>>, vector<1x96xf32>
    %c0_2 = arith.constant 0 : index
    %c0_3 = arith.constant 0 : index
    %5 = vector.load %arg4[%c0_2, %c0_3] : memref<32x96xf32, #tpu.memory_space<vmem>>, vector<32x96xf32>
    %cst = arith.constant dense<0.000000e+00> : vector<1x96xf32>
    %6 = tpu.matmul %0, %5, %cst {dimension_numbers = #tpu.dot_dimension_numbers<[1], [0], [0], [1], [0, 0, 1, 1], [], []>} : vector<1x32xf32>, vector<32x96xf32>, vector<1x96xf32> -> vector<1x96xf32>
    %c0_4 = arith.constant 0 : index
    %c0_5 = arith.constant 0 : index
    %7 = vector.load %arg5[%c0_4, %c0_5] : memref<1x96xf32, #tpu.memory_space<vmem>>, vector<1x96xf32>
    %8 = arith.addf %6, %7 : vector<1x96xf32>
    %9 = vector.extract_strided_slice %4 {offsets = [0, 0], sizes = [1, 64], strides = [1, 1]} : vector<1x96xf32> to vector<1x64xf32>
    %10 = vector.extract_strided_slice %8 {offsets = [0, 0], sizes = [1, 64], strides = [1, 1]} : vector<1x96xf32> to vector<1x64xf32>
    %11 = arith.addf %9, %10 : vector<1x64xf32>
    %12 = arith.negf %11 : vector<1x64xf32>
    %13 = math.exp %12 : vector<1x64xf32>
    %cst_6 = arith.constant 1.000000e+00 : f32
    %14 = vector.broadcast %cst_6 : f32 to vector<1x64xf32>
    %15 = arith.addf %14, %13 : vector<1x64xf32>
    %16 = arith.divf %14, %15 : vector<1x64xf32>
    %17 = vector.extract_strided_slice %16 {offsets = [0, 0], sizes = [1, 32], strides = [1, 1]} : vector<1x64xf32> to vector<1x32xf32>
    %18 = vector.extract_strided_slice %16 {offsets = [0, 32], sizes = [1, 32], strides = [1, 1]} : vector<1x64xf32> to vector<1x32xf32>
    %19 = vector.extract_strided_slice %4 {offsets = [0, 64], sizes = [1, 32], strides = [1, 1]} : vector<1x96xf32> to vector<1x32xf32>
    %20 = vector.extract_strided_slice %8 {offsets = [0, 64], sizes = [1, 32], strides = [1, 1]} : vector<1x96xf32> to vector<1x32xf32>
    %21 = arith.mulf %17, %20 : vector<1x32xf32>
    %22 = arith.addf %19, %21 : vector<1x32xf32>
    %23 = math.tanh %22 : vector<1x32xf32>
    %cst_7 = arith.constant 1.000000e+00 : f32
    %24 = vector.broadcast %cst_7 : f32 to vector<1x32xf32>
    %25 = arith.subf %24, %18 : vector<1x32xf32>
    %26 = arith.mulf %25, %23 : vector<1x32xf32>
    %27 = arith.mulf %18, %0 : vector<1x32xf32>
    %28 = arith.addf %26, %27 : vector<1x32xf32>
    %c0_8 = arith.constant 0 : index
    %c0_9 = arith.constant 0 : index
    %29 = vector.load %arg6[%c0_8, %c0_9] : memref<32x128xf32, #tpu.memory_space<vmem>>, vector<32x128xf32>
    %cst_10 = arith.constant dense<0.000000e+00> : vector<1x128xf32>
    %30 = tpu.matmul %28, %29, %cst_10 {dimension_numbers = #tpu.dot_dimension_numbers<[1], [0], [0], [1], [0, 0, 1, 1], [], []>} : vector<1x32xf32>, vector<32x128xf32>, vector<1x128xf32> -> vector<1x128xf32>
    %c0_11 = arith.constant 0 : index
    %c0_12 = arith.constant 0 : index
    %31 = vector.load %arg7[%c0_11, %c0_12] : memref<1x128xf32, #tpu.memory_space<vmem>>, vector<1x128xf32>
    %32 = arith.addf %30, %31 : vector<1x128xf32>
    %cst_13 = arith.constant dense<0xFF800000> : vector<1xf32>
    %33 = vector.multi_reduction <maximumf>, %32, %cst_13 [1] : vector<1x128xf32> to vector<1xf32>
    %34 = vector.shape_cast %33 : vector<1xf32> to vector<1x1xf32>
    %35 = vector.broadcast %34 : vector<1x1xf32> to vector<1x128xf32>
    %36 = arith.subf %32, %35 : vector<1x128xf32>
    %37 = math.exp %36 : vector<1x128xf32>
    %cst_14 = arith.constant dense<0.000000e+00> : vector<1xf32>
    %38 = vector.multi_reduction <add>, %37, %cst_14 [1] : vector<1x128xf32> to vector<1xf32>
    %39 = vector.shape_cast %38 : vector<1xf32> to vector<1x1xf32>
    %40 = math.log %39 : vector<1x1xf32>
    %41 = vector.broadcast %40 : vector<1x1xf32> to vector<1x128xf32>
    %42 = arith.subf %36, %41 : vector<1x128xf32>
    %43 = arith.index_cast %c0_i32 : i32 to index
    %c0_15 = arith.constant 0 : index
    %44 = vector.load %arg8[%43, %c0_15] : memref<8x128xf32, #tpu.memory_space<vmem>>, vector<1x128xf32>
    tpu.vector_store %arg8[%43, %c0_15], %42 {strides = array<i32>} : memref<8x128xf32, #tpu.memory_space<vmem>>, vector<1x128xf32>,
    %c1_i32 = arith.constant 1 : i32
    %45 = arith.index_cast %c1_i32 : i32 to index
    %46 = memref.load %arg1[%45] : memref<8xi32, #tpu.memory_space<smem>>
    %47 = arith.index_cast %46 : i32 to index
    %c0_16 = arith.constant 0 : index
    %48 = vector.load %arg2[%47, %c0_16] : memref<64x96xf32, #tpu.memory_space<vmem>>, vector<1x96xf32>
    %c0_17 = arith.constant 0 : index
    %c0_18 = arith.constant 0 : index
    %49 = vector.load %arg4[%c0_17, %c0_18] : memref<32x96xf32, #tpu.memory_space<vmem>>, vector<32x96xf32>
    %cst_19 = arith.constant dense<0.000000e+00> : vector<1x96xf32>
    %50 = tpu.matmul %28, %49, %cst_19 {dimension_numbers = #tpu.dot_dimension_numbers<[1], [0], [0], [1], [0, 0, 1, 1], [], []>} : vector<1x32xf32>, vector<32x96xf32>, vector<1x96xf32> -> vector<1x96xf32>
    %c0_20 = arith.constant 0 : index
    %c0_21 = arith.constant 0 : index
    %51 = vector.load %arg5[%c0_20, %c0_21] : memref<1x96xf32, #tpu.memory_space<vmem>>, vector<1x96xf32>
    %52 = arith.addf %50, %51 : vector<1x96xf32>
    %53 = vector.extract_strided_slice %48 {offsets = [0, 0], sizes = [1, 64], strides = [1, 1]} : vector<1x96xf32> to vector<1x64xf32>
    %54 = vector.extract_strided_slice %52 {offsets = [0, 0], sizes = [1, 64], strides = [1, 1]} : vector<1x96xf32> to vector<1x64xf32>
    %55 = arith.addf %53, %54 : vector<1x64xf32>
    %56 = arith.negf %55 : vector<1x64xf32>
    %57 = math.exp %56 : vector<1x64xf32>
    %cst_22 = arith.constant 1.000000e+00 : f32
    %58 = vector.broadcast %cst_22 : f32 to vector<1x64xf32>
    %59 = arith.addf %58, %57 : vector<1x64xf32>
    %60 = arith.divf %58, %59 : vector<1x64xf32>
    %61 = vector.extract_strided_slice %60 {offsets = [0, 0], sizes = [1, 32], strides = [1, 1]} : vector<1x64xf32> to vector<1x32xf32>
    %62 = vector.extract_strided_slice %60 {offsets = [0, 32], sizes = [1, 32], strides = [1, 1]} : vector<1x64xf32> to vector<1x32xf32>
    %63 = vector.extract_strided_slice %48 {offsets = [0, 64], sizes = [1, 32], strides = [1, 1]} : vector<1x96xf32> to vector<1x32xf32>
    %64 = vector.extract_strided_slice %52 {offsets = [0, 64], sizes = [1, 32], strides = [1, 1]} : vector<1x96xf32> to vector<1x32xf32>
    %65 = arith.mulf %61, %64 : vector<1x32xf32>
    %66 = arith.addf %63, %65 : vector<1x32xf32>
    %67 = math.tanh %66 : vector<1x32xf32>
    %cst_23 = arith.constant 1.000000e+00 : f32
    %68 = vector.broadcast %cst_23 : f32 to vector<1x32xf32>
    %69 = arith.subf %68, %62 : vector<1x32xf32>
    %70 = arith.mulf %69, %67 : vector<1x32xf32>
    %71 = arith.mulf %62, %28 : vector<1x32xf32>
    %72 = arith.addf %70, %71 : vector<1x32xf32>
    %c0_24 = arith.constant 0 : index
    %c0_25 = arith.constant 0 : index
    %73 = vector.load %arg6[%c0_24, %c0_25] : memref<32x128xf32, #tpu.memory_space<vmem>>, vector<32x128xf32>
    %cst_26 = arith.constant dense<0.000000e+00> : vector<1x128xf32>
    %74 = tpu.matmul %72, %73, %cst_26 {dimension_numbers = #tpu.dot_dimension_numbers<[1], [0], [0], [1], [0, 0, 1, 1], [], []>} : vector<1x32xf32>, vector<32x128xf32>, vector<1x128xf32> -> vector<1x128xf32>
    %c0_27 = arith.constant 0 : index
    %c0_28 = arith.constant 0 : index
    %75 = vector.load %arg7[%c0_27, %c0_28] : memref<1x128xf32, #tpu.memory_space<vmem>>, vector<1x128xf32>
    %76 = arith.addf %74, %75 : vector<1x128xf32>
    %cst_29 = arith.constant dense<0xFF800000> : vector<1xf32>
    %77 = vector.multi_reduction <maximumf>, %76, %cst_29 [1] : vector<1x128xf32> to vector<1xf32>
    %78 = vector.shape_cast %77 : vector<1xf32> to vector<1x1xf32>
    %79 = vector.broadcast %78 : vector<1x1xf32> to vector<1x128xf32>
    %80 = arith.subf %76, %79 : vector<1x128xf32>
    %81 = math.exp %80 : vector<1x128xf32>
    %cst_30 = arith.constant dense<0.000000e+00> : vector<1xf32>
    %82 = vector.multi_reduction <add>, %81, %cst_30 [1] : vector<1x128xf32> to vector<1xf32>
    %83 = vector.shape_cast %82 : vector<1xf32> to vector<1x1xf32>
    %84 = math.log %83 : vector<1x1xf32>
    %85 = vector.broadcast %84 : vector<1x1xf32> to vector<1x128xf32>
    %86 = arith.subf %80, %85 : vector<1x128xf32>
    %87 = arith.index_cast %c1_i32 : i32 to index
    %c0_31 = arith.constant 0 : index
    %88 = vector.load %arg8[%87, %c0_31] : memref<8x128xf32, #tpu.memory_space<vmem>>, vector<1x128xf32>
    tpu.vector_store %arg8[%87, %c0_31], %86 {strides = array<i32>} : memref<8x128xf32, #tpu.memory_space<vmem>>, vector<1x128xf32>,
    %c2_i32 = arith.constant 2 : i32
    %89 = arith.index_cast %c2_i32 : i32 to index
    %90 = memref.load %arg1[%89] : memref<8xi32, #tpu.memory_space<smem>>
    %91 = arith.index_cast %90 : i32 to index
    %c0_32 = arith.constant 0 : index
    %92 = vector.load %arg2[%91, %c0_32] : memref<64x96xf32, #tpu.memory_space<vmem>>, vector<1x96xf32>
    %c0_33 = arith.constant 0 : index
    %c0_34 = arith.constant 0 : index
    %93 = vector.load %arg4[%c0_33, %c0_34] : memref<32x96xf32, #tpu.memory_space<vmem>>, vector<32x96xf32>
    %cst_35 = arith.constant dense<0.000000e+00> : vector<1x96xf32>
    %94 = tpu.matmul %72, %93, %cst_35 {dimension_numbers = #tpu.dot_dimension_numbers<[1], [0], [0], [1], [0, 0, 1, 1], [], []>} : vector<1x32xf32>, vector<32x96xf32>, vector<1x96xf32> -> vector<1x96xf32>
    %c0_36 = arith.constant 0 : index
    %c0_37 = arith.constant 0 : index
    %95 = vector.load %arg5[%c0_36, %c0_37] : memref<1x96xf32, #tpu.memory_space<vmem>>, vector<1x96xf32>
    %96 = arith.addf %94, %95 : vector<1x96xf32>
    %97 = vector.extract_strided_slice %92 {offsets = [0, 0], sizes = [1, 64], strides = [1, 1]} : vector<1x96xf32> to vector<1x64xf32>
    %98 = vector.extract_strided_slice %96 {offsets = [0, 0], sizes = [1, 64], strides = [1, 1]} : vector<1x96xf32> to vector<1x64xf32>
    %99 = arith.addf %97, %98 : vector<1x64xf32>
    %100 = arith.negf %99 : vector<1x64xf32>
    %101 = math.exp %100 : vector<1x64xf32>
    %cst_38 = arith.constant 1.000000e+00 : f32
    %102 = vector.broadcast %cst_38 : f32 to vector<1x64xf32>
    %103 = arith.addf %102, %101 : vector<1x64xf32>
    %104 = arith.divf %102, %103 : vector<1x64xf32>
    %105 = vector.extract_strided_slice %104 {offsets = [0, 0], sizes = [1, 32], strides = [1, 1]} : vector<1x64xf32> to vector<1x32xf32>
    %106 = vector.extract_strided_slice %104 {offsets = [0, 32], sizes = [1, 32], strides = [1, 1]} : vector<1x64xf32> to vector<1x32xf32>
    %107 = vector.extract_strided_slice %92 {offsets = [0, 64], sizes = [1, 32], strides = [1, 1]} : vector<1x96xf32> to vector<1x32xf32>
    %108 = vector.extract_strided_slice %96 {offsets = [0, 64], sizes = [1, 32], strides = [1, 1]} : vector<1x96xf32> to vector<1x32xf32>
    %109 = arith.mulf %105, %108 : vector<1x32xf32>
    %110 = arith.addf %107, %109 : vector<1x32xf32>
    %111 = math.tanh %110 : vector<1x32xf32>
    %cst_39 = arith.constant 1.000000e+00 : f32
    %112 = vector.broadcast %cst_39 : f32 to vector<1x32xf32>
    %113 = arith.subf %112, %106 : vector<1x32xf32>
    %114 = arith.mulf %113, %111 : vector<1x32xf32>
    %115 = arith.mulf %106, %72 : vector<1x32xf32>
    %116 = arith.addf %114, %115 : vector<1x32xf32>
    %c0_40 = arith.constant 0 : index
    %c0_41 = arith.constant 0 : index
    %117 = vector.load %arg6[%c0_40, %c0_41] : memref<32x128xf32, #tpu.memory_space<vmem>>, vector<32x128xf32>
    %cst_42 = arith.constant dense<0.000000e+00> : vector<1x128xf32>
    %118 = tpu.matmul %116, %117, %cst_42 {dimension_numbers = #tpu.dot_dimension_numbers<[1], [0], [0], [1], [0, 0, 1, 1], [], []>} : vector<1x32xf32>, vector<32x128xf32>, vector<1x128xf32> -> vector<1x128xf32>
    %c0_43 = arith.constant 0 : index
    %c0_44 = arith.constant 0 : index
    %119 = vector.load %arg7[%c0_43, %c0_44] : memref<1x128xf32, #tpu.memory_space<vmem>>, vector<1x128xf32>
    %120 = arith.addf %118, %119 : vector<1x128xf32>
    %cst_45 = arith.constant dense<0xFF800000> : vector<1xf32>
    %121 = vector.multi_reduction <maximumf>, %120, %cst_45 [1] : vector<1x128xf32> to vector<1xf32>
    %122 = vector.shape_cast %121 : vector<1xf32> to vector<1x1xf32>
    %123 = vector.broadcast %122 : vector<1x1xf32> to vector<1x128xf32>
    %124 = arith.subf %120, %123 : vector<1x128xf32>
    %125 = math.exp %124 : vector<1x128xf32>
    %cst_46 = arith.constant dense<0.000000e+00> : vector<1xf32>
    %126 = vector.multi_reduction <add>, %125, %cst_46 [1] : vector<1x128xf32> to vector<1xf32>
    %127 = vector.shape_cast %126 : vector<1xf32> to vector<1x1xf32>
    %128 = math.log %127 : vector<1x1xf32>
    %129 = vector.broadcast %128 : vector<1x1xf32> to vector<1x128xf32>
    %130 = arith.subf %124, %129 : vector<1x128xf32>
    %131 = arith.index_cast %c2_i32 : i32 to index
    %c0_47 = arith.constant 0 : index
    %132 = vector.load %arg8[%131, %c0_47] : memref<8x128xf32, #tpu.memory_space<vmem>>, vector<1x128xf32>
    tpu.vector_store %arg8[%131, %c0_47], %130 {strides = array<i32>} : memref<8x128xf32, #tpu.memory_space<vmem>>, vector<1x128xf32>,
    %c3_i32 = arith.constant 3 : i32
    %133 = arith.index_cast %c3_i32 : i32 to index
    %134 = memref.load %arg1[%133] : memref<8xi32, #tpu.memory_space<smem>>
    %135 = arith.index_cast %134 : i32 to index
    %c0_48 = arith.constant 0 : index
    %136 = vector.load %arg2[%135, %c0_48] : memref<64x96xf32, #tpu.memory_space<vmem>>, vector<1x96xf32>
    %c0_49 = arith.constant 0 : index
    %c0_50 = arith.constant 0 : index
    %137 = vector.load %arg4[%c0_49, %c0_50] : memref<32x96xf32, #tpu.memory_space<vmem>>, vector<32x96xf32>
    %cst_51 = arith.constant dense<0.000000e+00> : vector<1x96xf32>
    %138 = tpu.matmul %116, %137, %cst_51 {dimension_numbers = #tpu.dot_dimension_numbers<[1], [0], [0], [1], [0, 0, 1, 1], [], []>} : vector<1x32xf32>, vector<32x96xf32>, vector<1x96xf32> -> vector<1x96xf32>
    %c0_52 = arith.constant 0 : index
    %c0_53 = arith.constant 0 : index
    %139 = vector.load %arg5[%c0_52, %c0_53] : memref<1x96xf32, #tpu.memory_space<vmem>>, vector<1x96xf32>
    %140 = arith.addf %138, %139 : vector<1x96xf32>
    %141 = vector.extract_strided_slice %136 {offsets = [0, 0], sizes = [1, 64], strides = [1, 1]} : vector<1x96xf32> to vector<1x64xf32>
    %142 = vector.extract_strided_slice %140 {offsets = [0, 0], sizes = [1, 64], strides = [1, 1]} : vector<1x96xf32> to vector<1x64xf32>
    %143 = arith.addf %141, %142 : vector<1x64xf32>
    %144 = arith.negf %143 : vector<1x64xf32>
    %145 = math.exp %144 : vector<1x64xf32>
    %cst_54 = arith.constant 1.000000e+00 : f32
    %146 = vector.broadcast %cst_54 : f32 to vector<1x64xf32>
    %147 = arith.addf %146, %145 : vector<1x64xf32>
    %148 = arith.divf %146, %147 : vector<1x64xf32>
    %149 = vector.extract_strided_slice %148 {offsets = [0, 0], sizes = [1, 32], strides = [1, 1]} : vector<1x64xf32> to vector<1x32xf32>
    %150 = vector.extract_strided_slice %148 {offsets = [0, 32], sizes = [1, 32], strides = [1, 1]} : vector<1x64xf32> to vector<1x32xf32>
    %151 = vector.extract_strided_slice %136 {offsets = [0, 64], sizes = [1, 32], strides = [1, 1]} : vector<1x96xf32> to vector<1x32xf32>
    %152 = vector.extract_strided_slice %140 {offsets = [0, 64], sizes = [1, 32], strides = [1, 1]} : vector<1x96xf32> to vector<1x32xf32>
    %153 = arith.mulf %149, %152 : vector<1x32xf32>
    %154 = arith.addf %151, %153 : vector<1x32xf32>
    %155 = math.tanh %154 : vector<1x32xf32>
    %cst_55 = arith.constant 1.000000e+00 : f32
    %156 = vector.broadcast %cst_55 : f32 to vector<1x32xf32>
    %157 = arith.subf %156, %150 : vector<1x32xf32>
    %158 = arith.mulf %157, %155 : vector<1x32xf32>
    %159 = arith.mulf %150, %116 : vector<1x32xf32>
    %160 = arith.addf %158, %159 : vector<1x32xf32>
    %c0_56 = arith.constant 0 : index
    %c0_57 = arith.constant 0 : index
    %161 = vector.load %arg6[%c0_56, %c0_57] : memref<32x128xf32, #tpu.memory_space<vmem>>, vector<32x128xf32>
    %cst_58 = arith.constant dense<0.000000e+00> : vector<1x128xf32>
    %162 = tpu.matmul %160, %161, %cst_58 {dimension_numbers = #tpu.dot_dimension_numbers<[1], [0], [0], [1], [0, 0, 1, 1], [], []>} : vector<1x32xf32>, vector<32x128xf32>, vector<1x128xf32> -> vector<1x128xf32>
    %c0_59 = arith.constant 0 : index
    %c0_60 = arith.constant 0 : index
    %163 = vector.load %arg7[%c0_59, %c0_60] : memref<1x128xf32, #tpu.memory_space<vmem>>, vector<1x128xf32>
    %164 = arith.addf %162, %163 : vector<1x128xf32>
    %cst_61 = arith.constant dense<0xFF800000> : vector<1xf32>
    %165 = vector.multi_reduction <maximumf>, %164, %cst_61 [1] : vector<1x128xf32> to vector<1xf32>
    %166 = vector.shape_cast %165 : vector<1xf32> to vector<1x1xf32>
    %167 = vector.broadcast %166 : vector<1x1xf32> to vector<1x128xf32>
    %168 = arith.subf %164, %167 : vector<1x128xf32>
    %169 = math.exp %168 : vector<1x128xf32>
    %cst_62 = arith.constant dense<0.000000e+00> : vector<1xf32>
    %170 = vector.multi_reduction <add>, %169, %cst_62 [1] : vector<1x128xf32> to vector<1xf32>
    %171 = vector.shape_cast %170 : vector<1xf32> to vector<1x1xf32>
    %172 = math.log %171 : vector<1x1xf32>
    %173 = vector.broadcast %172 : vector<1x1xf32> to vector<1x128xf32>
    %174 = arith.subf %168, %173 : vector<1x128xf32>
    %175 = arith.index_cast %c3_i32 : i32 to index
    %c0_63 = arith.constant 0 : index
    %176 = vector.load %arg8[%175, %c0_63] : memref<8x128xf32, #tpu.memory_space<vmem>>, vector<1x128xf32>
    tpu.vector_store %arg8[%175, %c0_63], %174 {strides = array<i32>} : memref<8x128xf32, #tpu.memory_space<vmem>>, vector<1x128xf32>,
    %c4_i32 = arith.constant 4 : i32
    %177 = arith.index_cast %c4_i32 : i32 to index
    %178 = memref.load %arg1[%177] : memref<8xi32, #tpu.memory_space<smem>>
    %179 = arith.index_cast %178 : i32 to index
    %c0_64 = arith.constant 0 : index
    %180 = vector.load %arg2[%179, %c0_64] : memref<64x96xf32, #tpu.memory_space<vmem>>, vector<1x96xf32>
    %c0_65 = arith.constant 0 : index
    %c0_66 = arith.constant 0 : index
    %181 = vector.load %arg4[%c0_65, %c0_66] : memref<32x96xf32, #tpu.memory_space<vmem>>, vector<32x96xf32>
    %cst_67 = arith.constant dense<0.000000e+00> : vector<1x96xf32>
    %182 = tpu.matmul %160, %181, %cst_67 {dimension_numbers = #tpu.dot_dimension_numbers<[1], [0], [0], [1], [0, 0, 1, 1], [], []>} : vector<1x32xf32>, vector<32x96xf32>, vector<1x96xf32> -> vector<1x96xf32>
    %c0_68 = arith.constant 0 : index
    %c0_69 = arith.constant 0 : index
    %183 = vector.load %arg5[%c0_68, %c0_69] : memref<1x96xf32, #tpu.memory_space<vmem>>, vector<1x96xf32>
    %184 = arith.addf %182, %183 : vector<1x96xf32>
    %185 = vector.extract_strided_slice %180 {offsets = [0, 0], sizes = [1, 64], strides = [1, 1]} : vector<1x96xf32> to vector<1x64xf32>
    %186 = vector.extract_strided_slice %184 {offsets = [0, 0], sizes = [1, 64], strides = [1, 1]} : vector<1x96xf32> to vector<1x64xf32>
    %187 = arith.addf %185, %186 : vector<1x64xf32>
    %188 = arith.negf %187 : vector<1x64xf32>
    %189 = math.exp %188 : vector<1x64xf32>
    %cst_70 = arith.constant 1.000000e+00 : f32
    %190 = vector.broadcast %cst_70 : f32 to vector<1x64xf32>
    %191 = arith.addf %190, %189 : vector<1x64xf32>
    %192 = arith.divf %190, %191 : vector<1x64xf32>
    %193 = vector.extract_strided_slice %192 {offsets = [0, 0], sizes = [1, 32], strides = [1, 1]} : vector<1x64xf32> to vector<1x32xf32>
    %194 = vector.extract_strided_slice %192 {offsets = [0, 32], sizes = [1, 32], strides = [1, 1]} : vector<1x64xf32> to vector<1x32xf32>
    %195 = vector.extract_strided_slice %180 {offsets = [0, 64], sizes = [1, 32], strides = [1, 1]} : vector<1x96xf32> to vector<1x32xf32>
    %196 = vector.extract_strided_slice %184 {offsets = [0, 64], sizes = [1, 32], strides = [1, 1]} : vector<1x96xf32> to vector<1x32xf32>
    %197 = arith.mulf %193, %196 : vector<1x32xf32>
    %198 = arith.addf %195, %197 : vector<1x32xf32>
    %199 = math.tanh %198 : vector<1x32xf32>
    %cst_71 = arith.constant 1.000000e+00 : f32
    %200 = vector.broadcast %cst_71 : f32 to vector<1x32xf32>
    %201 = arith.subf %200, %194 : vector<1x32xf32>
    %202 = arith.mulf %201, %199 : vector<1x32xf32>
    %203 = arith.mulf %194, %160 : vector<1x32xf32>
    %204 = arith.addf %202, %203 : vector<1x32xf32>
    %c0_72 = arith.constant 0 : index
    %c0_73 = arith.constant 0 : index
    %205 = vector.load %arg6[%c0_72, %c0_73] : memref<32x128xf32, #tpu.memory_space<vmem>>, vector<32x128xf32>
    %cst_74 = arith.constant dense<0.000000e+00> : vector<1x128xf32>
    %206 = tpu.matmul %204, %205, %cst_74 {dimension_numbers = #tpu.dot_dimension_numbers<[1], [0], [0], [1], [0, 0, 1, 1], [], []>} : vector<1x32xf32>, vector<32x128xf32>, vector<1x128xf32> -> vector<1x128xf32>
    %c0_75 = arith.constant 0 : index
    %c0_76 = arith.constant 0 : index
    %207 = vector.load %arg7[%c0_75, %c0_76] : memref<1x128xf32, #tpu.memory_space<vmem>>, vector<1x128xf32>
    %208 = arith.addf %206, %207 : vector<1x128xf32>
    %cst_77 = arith.constant dense<0xFF800000> : vector<1xf32>
    %209 = vector.multi_reduction <maximumf>, %208, %cst_77 [1] : vector<1x128xf32> to vector<1xf32>
    %210 = vector.shape_cast %209 : vector<1xf32> to vector<1x1xf32>
    %211 = vector.broadcast %210 : vector<1x1xf32> to vector<1x128xf32>
    %212 = arith.subf %208, %211 : vector<1x128xf32>
    %213 = math.exp %212 : vector<1x128xf32>
    %cst_78 = arith.constant dense<0.000000e+00> : vector<1xf32>
    %214 = vector.multi_reduction <add>, %213, %cst_78 [1] : vector<1x128xf32> to vector<1xf32>
    %215 = vector.shape_cast %214 : vector<1xf32> to vector<1x1xf32>
    %216 = math.log %215 : vector<1x1xf32>
    %217 = vector.broadcast %216 : vector<1x1xf32> to vector<1x128xf32>
    %218 = arith.subf %212, %217 : vector<1x128xf32>
    %219 = arith.index_cast %c4_i32 : i32 to index
    %c0_79 = arith.constant 0 : index
    %220 = vector.load %arg8[%219, %c0_79] : memref<8x128xf32, #tpu.memory_space<vmem>>, vector<1x128xf32>
    tpu.vector_store %arg8[%219, %c0_79], %218 {strides = array<i32>} : memref<8x128xf32, #tpu.memory_space<vmem>>, vector<1x128xf32>,
    %c5_i32 = arith.constant 5 : i32
    %221 = arith.index_cast %c5_i32 : i32 to index
    %222 = memref.load %arg1[%221] : memref<8xi32, #tpu.memory_space<smem>>
    %223 = arith.index_cast %222 : i32 to index
    %c0_80 = arith.constant 0 : index
    %224 = vector.load %arg2[%223, %c0_80] : memref<64x96xf32, #tpu.memory_space<vmem>>, vector<1x96xf32>
    %c0_81 = arith.constant 0 : index
    %c0_82 = arith.constant 0 : index
    %225 = vector.load %arg4[%c0_81, %c0_82] : memref<32x96xf32, #tpu.memory_space<vmem>>, vector<32x96xf32>
    %cst_83 = arith.constant dense<0.000000e+00> : vector<1x96xf32>
    %226 = tpu.matmul %204, %225, %cst_83 {dimension_numbers = #tpu.dot_dimension_numbers<[1], [0], [0], [1], [0, 0, 1, 1], [], []>} : vector<1x32xf32>, vector<32x96xf32>, vector<1x96xf32> -> vector<1x96xf32>
    %c0_84 = arith.constant 0 : index
    %c0_85 = arith.constant 0 : index
    %227 = vector.load %arg5[%c0_84, %c0_85] : memref<1x96xf32, #tpu.memory_space<vmem>>, vector<1x96xf32>
    %228 = arith.addf %226, %227 : vector<1x96xf32>
    %229 = vector.extract_strided_slice %224 {offsets = [0, 0], sizes = [1, 64], strides = [1, 1]} : vector<1x96xf32> to vector<1x64xf32>
    %230 = vector.extract_strided_slice %228 {offsets = [0, 0], sizes = [1, 64], strides = [1, 1]} : vector<1x96xf32> to vector<1x64xf32>
    %231 = arith.addf %229, %230 : vector<1x64xf32>
    %232 = arith.negf %231 : vector<1x64xf32>
    %233 = math.exp %232 : vector<1x64xf32>
    %cst_86 = arith.constant 1.000000e+00 : f32
    %234 = vector.broadcast %cst_86 : f32 to vector<1x64xf32>
    %235 = arith.addf %234, %233 : vector<1x64xf32>
    %236 = arith.divf %234, %235 : vector<1x64xf32>
    %237 = vector.extract_strided_slice %236 {offsets = [0, 0], sizes = [1, 32], strides = [1, 1]} : vector<1x64xf32> to vector<1x32xf32>
    %238 = vector.extract_strided_slice %236 {offsets = [0, 32], sizes = [1, 32], strides = [1, 1]} : vector<1x64xf32> to vector<1x32xf32>
    %239 = vector.extract_strided_slice %224 {offsets = [0, 64], sizes = [1, 32], strides = [1, 1]} : vector<1x96xf32> to vector<1x32xf32>
    %240 = vector.extract_strided_slice %228 {offsets = [0, 64], sizes = [1, 32], strides = [1, 1]} : vector<1x96xf32> to vector<1x32xf32>
    %241 = arith.mulf %237, %240 : vector<1x32xf32>
    %242 = arith.addf %239, %241 : vector<1x32xf32>
    %243 = math.tanh %242 : vector<1x32xf32>
    %cst_87 = arith.constant 1.000000e+00 : f32
    %244 = vector.broadcast %cst_87 : f32 to vector<1x32xf32>
    %245 = arith.subf %244, %238 : vector<1x32xf32>
    %246 = arith.mulf %245, %243 : vector<1x32xf32>
    %247 = arith.mulf %238, %204 : vector<1x32xf32>
    %248 = arith.addf %246, %247 : vector<1x32xf32>
    %c0_88 = arith.constant 0 : index
    %c0_89 = arith.constant 0 : index
    %249 = vector.load %arg6[%c0_88, %c0_89] : memref<32x128xf32, #tpu.memory_space<vmem>>, vector<32x128xf32>
    %cst_90 = arith.constant dense<0.000000e+00> : vector<1x128xf32>
    %250 = tpu.matmul %248, %249, %cst_90 {dimension_numbers = #tpu.dot_dimension_numbers<[1], [0], [0], [1], [0, 0, 1, 1], [], []>} : vector<1x32xf32>, vector<32x128xf32>, vector<1x128xf32> -> vector<1x128xf32>
    %c0_91 = arith.constant 0 : index
    %c0_92 = arith.constant 0 : index
    %251 = vector.load %arg7[%c0_91, %c0_92] : memref<1x128xf32, #tpu.memory_space<vmem>>, vector<1x128xf32>
    %252 = arith.addf %250, %251 : vector<1x128xf32>
    %cst_93 = arith.constant dense<0xFF800000> : vector<1xf32>
    %253 = vector.multi_reduction <maximumf>, %252, %cst_93 [1] : vector<1x128xf32> to vector<1xf32>
    %254 = vector.shape_cast %253 : vector<1xf32> to vector<1x1xf32>
    %255 = vector.broadcast %254 : vector<1x1xf32> to vector<1x128xf32>
    %256 = arith.subf %252, %255 : vector<1x128xf32>
    %257 = math.exp %256 : vector<1x128xf32>
    %cst_94 = arith.constant dense<0.000000e+00> : vector<1xf32>
    %258 = vector.multi_reduction <add>, %257, %cst_94 [1] : vector<1x128xf32> to vector<1xf32>
    %259 = vector.shape_cast %258 : vector<1xf32> to vector<1x1xf32>
    %260 = math.log %259 : vector<1x1xf32>
    %261 = vector.broadcast %260 : vector<1x1xf32> to vector<1x128xf32>
    %262 = arith.subf %256, %261 : vector<1x128xf32>
    %263 = arith.index_cast %c5_i32 : i32 to index
    %c0_95 = arith.constant 0 : index
    %264 = vector.load %arg8[%263, %c0_95] : memref<8x128xf32, #tpu.memory_space<vmem>>, vector<1x128xf32>
    tpu.vector_store %arg8[%263, %c0_95], %262 {strides = array<i32>} : memref<8x128xf32, #tpu.memory_space<vmem>>, vector<1x128xf32>,
    %c6_i32 = arith.constant 6 : i32
    %265 = arith.index_cast %c6_i32 : i32 to index
    %266 = memref.load %arg1[%265] : memref<8xi32, #tpu.memory_space<smem>>
    %267 = arith.index_cast %266 : i32 to index
    %c0_96 = arith.constant 0 : index
    %268 = vector.load %arg2[%267, %c0_96] : memref<64x96xf32, #tpu.memory_space<vmem>>, vector<1x96xf32>
    %c0_97 = arith.constant 0 : index
    %c0_98 = arith.constant 0 : index
    %269 = vector.load %arg4[%c0_97, %c0_98] : memref<32x96xf32, #tpu.memory_space<vmem>>, vector<32x96xf32>
    %cst_99 = arith.constant dense<0.000000e+00> : vector<1x96xf32>
    %270 = tpu.matmul %248, %269, %cst_99 {dimension_numbers = #tpu.dot_dimension_numbers<[1], [0], [0], [1], [0, 0, 1, 1], [], []>} : vector<1x32xf32>, vector<32x96xf32>, vector<1x96xf32> -> vector<1x96xf32>
    %c0_100 = arith.constant 0 : index
    %c0_101 = arith.constant 0 : index
    %271 = vector.load %arg5[%c0_100, %c0_101] : memref<1x96xf32, #tpu.memory_space<vmem>>, vector<1x96xf32>
    %272 = arith.addf %270, %271 : vector<1x96xf32>
    %273 = vector.extract_strided_slice %268 {offsets = [0, 0], sizes = [1, 64], strides = [1, 1]} : vector<1x96xf32> to vector<1x64xf32>
    %274 = vector.extract_strided_slice %272 {offsets = [0, 0], sizes = [1, 64], strides = [1, 1]} : vector<1x96xf32> to vector<1x64xf32>
    %275 = arith.addf %273, %274 : vector<1x64xf32>
    %276 = arith.negf %275 : vector<1x64xf32>
    %277 = math.exp %276 : vector<1x64xf32>
    %cst_102 = arith.constant 1.000000e+00 : f32
    %278 = vector.broadcast %cst_102 : f32 to vector<1x64xf32>
    %279 = arith.addf %278, %277 : vector<1x64xf32>
    %280 = arith.divf %278, %279 : vector<1x64xf32>
    %281 = vector.extract_strided_slice %280 {offsets = [0, 0], sizes = [1, 32], strides = [1, 1]} : vector<1x64xf32> to vector<1x32xf32>
    %282 = vector.extract_strided_slice %280 {offsets = [0, 32], sizes = [1, 32], strides = [1, 1]} : vector<1x64xf32> to vector<1x32xf32>
    %283 = vector.extract_strided_slice %268 {offsets = [0, 64], sizes = [1, 32], strides = [1, 1]} : vector<1x96xf32> to vector<1x32xf32>
    %284 = vector.extract_strided_slice %272 {offsets = [0, 64], sizes = [1, 32], strides = [1, 1]} : vector<1x96xf32> to vector<1x32xf32>
    %285 = arith.mulf %281, %284 : vector<1x32xf32>
    %286 = arith.addf %283, %285 : vector<1x32xf32>
    %287 = math.tanh %286 : vector<1x32xf32>
    %cst_103 = arith.constant 1.000000e+00 : f32
    %288 = vector.broadcast %cst_103 : f32 to vector<1x32xf32>
    %289 = arith.subf %288, %282 : vector<1x32xf32>
    %290 = arith.mulf %289, %287 : vector<1x32xf32>
    %291 = arith.mulf %282, %248 : vector<1x32xf32>
    %292 = arith.addf %290, %291 : vector<1x32xf32>
    %c0_104 = arith.constant 0 : index
    %c0_105 = arith.constant 0 : index
    %293 = vector.load %arg6[%c0_104, %c0_105] : memref<32x128xf32, #tpu.memory_space<vmem>>, vector<32x128xf32>
    %cst_106 = arith.constant dense<0.000000e+00> : vector<1x128xf32>
    %294 = tpu.matmul %292, %293, %cst_106 {dimension_numbers = #tpu.dot_dimension_numbers<[1], [0], [0], [1], [0, 0, 1, 1], [], []>} : vector<1x32xf32>, vector<32x128xf32>, vector<1x128xf32> -> vector<1x128xf32>
    %c0_107 = arith.constant 0 : index
    %c0_108 = arith.constant 0 : index
    %295 = vector.load %arg7[%c0_107, %c0_108] : memref<1x128xf32, #tpu.memory_space<vmem>>, vector<1x128xf32>
    %296 = arith.addf %294, %295 : vector<1x128xf32>
    %cst_109 = arith.constant dense<0xFF800000> : vector<1xf32>
    %297 = vector.multi_reduction <maximumf>, %296, %cst_109 [1] : vector<1x128xf32> to vector<1xf32>
    %298 = vector.shape_cast %297 : vector<1xf32> to vector<1x1xf32>
    %299 = vector.broadcast %298 : vector<1x1xf32> to vector<1x128xf32>
    %300 = arith.subf %296, %299 : vector<1x128xf32>
    %301 = math.exp %300 : vector<1x128xf32>
    %cst_110 = arith.constant dense<0.000000e+00> : vector<1xf32>
    %302 = vector.multi_reduction <add>, %301, %cst_110 [1] : vector<1x128xf32> to vector<1xf32>
    %303 = vector.shape_cast %302 : vector<1xf32> to vector<1x1xf32>
    %304 = math.log %303 : vector<1x1xf32>
    %305 = vector.broadcast %304 : vector<1x1xf32> to vector<1x128xf32>
    %306 = arith.subf %300, %305 : vector<1x128xf32>
    %307 = arith.index_cast %c6_i32 : i32 to index
    %c0_111 = arith.constant 0 : index
    %308 = vector.load %arg8[%307, %c0_111] : memref<8x128xf32, #tpu.memory_space<vmem>>, vector<1x128xf32>
    tpu.vector_store %arg8[%307, %c0_111], %306 {strides = array<i32>} : memref<8x128xf32, #tpu.memory_space<vmem>>, vector<1x128xf32>,
    %c7_i32 = arith.constant 7 : i32
    %309 = arith.index_cast %c7_i32 : i32 to index
    %310 = memref.load %arg1[%309] : memref<8xi32, #tpu.memory_space<smem>>
    %311 = arith.index_cast %310 : i32 to index
    %c0_112 = arith.constant 0 : index
    %312 = vector.load %arg2[%311, %c0_112] : memref<64x96xf32, #tpu.memory_space<vmem>>, vector<1x96xf32>
    %c0_113 = arith.constant 0 : index
    %c0_114 = arith.constant 0 : index
    %313 = vector.load %arg4[%c0_113, %c0_114] : memref<32x96xf32, #tpu.memory_space<vmem>>, vector<32x96xf32>
    %cst_115 = arith.constant dense<0.000000e+00> : vector<1x96xf32>
    %314 = tpu.matmul %292, %313, %cst_115 {dimension_numbers = #tpu.dot_dimension_numbers<[1], [0], [0], [1], [0, 0, 1, 1], [], []>} : vector<1x32xf32>, vector<32x96xf32>, vector<1x96xf32> -> vector<1x96xf32>
    %c0_116 = arith.constant 0 : index
    %c0_117 = arith.constant 0 : index
    %315 = vector.load %arg5[%c0_116, %c0_117] : memref<1x96xf32, #tpu.memory_space<vmem>>, vector<1x96xf32>
    %316 = arith.addf %314, %315 : vector<1x96xf32>
    %317 = vector.extract_strided_slice %312 {offsets = [0, 0], sizes = [1, 64], strides = [1, 1]} : vector<1x96xf32> to vector<1x64xf32>
    %318 = vector.extract_strided_slice %316 {offsets = [0, 0], sizes = [1, 64], strides = [1, 1]} : vector<1x96xf32> to vector<1x64xf32>
    %319 = arith.addf %317, %318 : vector<1x64xf32>
    %320 = arith.negf %319 : vector<1x64xf32>
    %321 = math.exp %320 : vector<1x64xf32>
    %cst_118 = arith.constant 1.000000e+00 : f32
    %322 = vector.broadcast %cst_118 : f32 to vector<1x64xf32>
    %323 = arith.addf %322, %321 : vector<1x64xf32>
    %324 = arith.divf %322, %323 : vector<1x64xf32>
    %325 = vector.extract_strided_slice %324 {offsets = [0, 0], sizes = [1, 32], strides = [1, 1]} : vector<1x64xf32> to vector<1x32xf32>
    %326 = vector.extract_strided_slice %324 {offsets = [0, 32], sizes = [1, 32], strides = [1, 1]} : vector<1x64xf32> to vector<1x32xf32>
    %327 = vector.extract_strided_slice %312 {offsets = [0, 64], sizes = [1, 32], strides = [1, 1]} : vector<1x96xf32> to vector<1x32xf32>
    %328 = vector.extract_strided_slice %316 {offsets = [0, 64], sizes = [1, 32], strides = [1, 1]} : vector<1x96xf32> to vector<1x32xf32>
    %329 = arith.mulf %325, %328 : vector<1x32xf32>
    %330 = arith.addf %327, %329 : vector<1x32xf32>
    %331 = math.tanh %330 : vector<1x32xf32>
    %cst_119 = arith.constant 1.000000e+00 : f32
    %332 = vector.broadcast %cst_119 : f32 to vector<1x32xf32>
    %333 = arith.subf %332, %326 : vector<1x32xf32>
    %334 = arith.mulf %333, %331 : vector<1x32xf32>
    %335 = arith.mulf %326, %292 : vector<1x32xf32>
    %336 = arith.addf %334, %335 : vector<1x32xf32>
    %c0_120 = arith.constant 0 : index
    %c0_121 = arith.constant 0 : index
    %337 = vector.load %arg6[%c0_120, %c0_121] : memref<32x128xf32, #tpu.memory_space<vmem>>, vector<32x128xf32>
    %cst_122 = arith.constant dense<0.000000e+00> : vector<1x128xf32>
    %338 = tpu.matmul %336, %337, %cst_122 {dimension_numbers = #tpu.dot_dimension_numbers<[1], [0], [0], [1], [0, 0, 1, 1], [], []>} : vector<1x32xf32>, vector<32x128xf32>, vector<1x128xf32> -> vector<1x128xf32>
    %c0_123 = arith.constant 0 : index
    %c0_124 = arith.constant 0 : index
    %339 = vector.load %arg7[%c0_123, %c0_124] : memref<1x128xf32, #tpu.memory_space<vmem>>, vector<1x128xf32>
    %340 = arith.addf %338, %339 : vector<1x128xf32>
    %cst_125 = arith.constant dense<0xFF800000> : vector<1xf32>
    %341 = vector.multi_reduction <maximumf>, %340, %cst_125 [1] : vector<1x128xf32> to vector<1xf32>
    %342 = vector.shape_cast %341 : vector<1xf32> to vector<1x1xf32>
    %343 = vector.broadcast %342 : vector<1x1xf32> to vector<1x128xf32>
    %344 = arith.subf %340, %343 : vector<1x128xf32>
    %345 = math.exp %344 : vector<1x128xf32>
    %cst_126 = arith.constant dense<0.000000e+00> : vector<1xf32>
    %346 = vector.multi_reduction <add>, %345, %cst_126 [1] : vector<1x128xf32> to vector<1xf32>
    %347 = vector.shape_cast %346 : vector<1xf32> to vector<1x1xf32>
    %348 = math.log %347 : vector<1x1xf32>
    %349 = vector.broadcast %348 : vector<1x1xf32> to vector<1x128xf32>
    %350 = arith.subf %344, %349 : vector<1x128xf32>
    %351 = arith.index_cast %c7_i32 : i32 to index
    %c0_127 = arith.constant 0 : index
    %352 = vector.load %arg8[%351, %c0_127] : memref<8x128xf32, #tpu.memory_space<vmem>>, vector<1x128xf32>
    tpu.vector_store %arg8[%351, %c0_127], %350 {strides = array<i32>} : memref<8x128xf32, #tpu.memory_space<vmem>>, vector<1x128xf32>,
    %c8_i32 = arith.constant 8 : i32
    %c0_128 = arith.constant 0 : index
    %c0_129 = arith.constant 0 : index
    %353 = vector.load %arg9[%c0_128, %c0_129] : memref<1x32xf32, #tpu.memory_space<vmem>>, vector<1x32xf32>
    tpu.vector_store %arg9[%c0_128, %c0_129], %336 {strides = array<i32>} : memref<1x32xf32, #tpu.memory_space<vmem>>, vector<1x32xf32>,
    return
  }
  func.func @transform_0(%arg0: i32, %arg1: memref<8xi32, #tpu.memory_space<smem>>) -> (i32, i32) {
    %c0_i32 = arith.constant 0 : i32
    %c0_i32_0 = arith.constant 0 : i32
    %c0_i32_1 = arith.constant 0 : i32
    return %c0_i32, %c0_i32_0 : i32, i32
  }
  func.func @transform_1(%arg0: i32, %arg1: memref<8xi32, #tpu.memory_space<smem>>) -> (i32, i32) {
    %c0_i32 = arith.constant 0 : i32
    %c0_i32_0 = arith.constant 0 : i32
    %c0_i32_1 = arith.constant 0 : i32
    return %c0_i32, %c0_i32_0 : i32, i32
  }
  func.func @transform_2(%arg0: i32, %arg1: memref<8xi32, #tpu.memory_space<smem>>) -> (i32, i32) {
    %c0_i32 = arith.constant 0 : i32
    %c0_i32_0 = arith.constant 0 : i32
    %c0_i32_1 = arith.constant 0 : i32
    return %c0_i32, %c0_i32_0 : i32, i32
  }
  func.func @transform_3(%arg0: i32, %arg1: memref<8xi32, #tpu.memory_space<smem>>) -> (i32, i32) {
    %c0_i32 = arith.constant 0 : i32
    %c0_i32_0 = arith.constant 0 : i32
    %c0_i32_1 = arith.constant 0 : i32
    return %c0_i32, %c0_i32_0 : i32, i32
  }
  func.func @transform_4(%arg0: i32, %arg1: memref<8xi32, #tpu.memory_space<smem>>) -> (i32, i32) {
    %c0_i32 = arith.constant 0 : i32
    %c0_i32_0 = arith.constant 0 : i32
    %c0_i32_1 = arith.constant 0 : i32
    return %c0_i32, %c0_i32_0 : i32, i32
  }
  func.func @transform_5(%arg0: i32, %arg1: memref<8xi32, #tpu.memory_space<smem>>) -> (i32, i32) {
    %c0_i32 = arith.constant 0 : i32
    %c0_i32_0 = arith.constant 0 : i32
    %c0_i32_1 = arith.constant 0 : i32
    return %c0_i32, %c0_i32_0 : i32, i32
  }
  func.func @transform_6(%arg0: i32, %arg1: memref<8xi32, #tpu.memory_space<smem>>) -> (i32, i32) {
    %c0_i32 = arith.constant 0 : i32
    %c0_i32_0 = arith.constant 0 : i32
    %c0_i32_1 = arith.constant 0 : i32
    return %c0_i32, %c0_i32_0 : i32, i32
  }
  func.func @transform_7(%arg0: i32, %arg1: memref<8xi32, #tpu.memory_space<smem>>) -> (i32, i32) {
    %c0_i32 = arith.constant 0 : i32
    %c0_i32_0 = arith.constant 0 : i32
    %c0_i32_1 = arith.constant 0 : i32
    return %c0_i32, %c0_i32_0 : i32, i32
  }
}

</mosaic_0001>

<bundles_post_ra>
// kernel: decoder_rnn_decode.1
= control target key start
LH: loop header
LB: loop body
LE: loop exit
PB: predicated region body
PF: predicated region fallthrough
CT: control target
= control target key end

     0   :  { %s2578_s0 = inlined_call_operand.vmem [shape: s32[8], index: 0, kind: input, shape index: {}]   ;;  %s2579_s1 = inlined_call_operand.vmem [shape: f32[64,96], index: 1, kind: input, shape index: {}]   ;;  %s2580_s2 = inlined_call_operand.vmem [shape: f32[1,32], index: 2, kind: input, shape index: {}]   ;;  %s2581_s3 = inlined_call_operand.vmem [shape: f32[32,96], index: 3, kind: input, shape index: {}]   ;;  %s2582_s4 = inlined_call_operand.vmem [shape: f32[1,96], index: 4, kind: input, shape index: {}]   ;;  %s2583_s5 = inlined_call_operand.vmem [shape: f32[32,128], index: 5, kind: input, shape index: {}]   ;;  %s2584_s6 = inlined_call_operand.vmem [shape: f32[1,128], index: 6, kind: input, shape index: {}]   ;;  %s2585_s7 = inlined_call_operand.hbm [shape: f32[8,128], index: 7, kind: output, shape index: {0}]   ;;  %s2586_s8 = inlined_call_operand.hbm [shape: f32[1,32], index: 8, kind: output, shape index: {1}]  }
   0x1   :  { %s14_s29 = sshll.u32 %s2578_s0, 4  ;;  %s15_s29 = int_to_ptr.vmem [resolvable:$true] %s14_s29 }
   0x2   :  { %s2134_s30 = scalar_lea.vmem %s15_s29, 16  ;;  %p2139_p1 = scmp.lt.s32.totalorder %s15_s29, %s15_s29 }
   0x3   :  { %p2135_p0 = scmp.ne.s32.totalorder %s15_s29, %s2134_s30  ;;  %p2140_p2 = scmp.lt.s32.totalorder %s2134_s30, %s2134_s30 }
   0x5   :  { %p2141_p3 = por %p2140_p2, %p2139_p1 }
   0x7   :  { %p2142_p4 = pnand %p2141_p3, %p2135_p0 }
   0x9   :  { %2145 = shalt.err (!%p2142_p4)  }
   0xa   :  { %s2196_s9 = smov [#allocation3]  }
   0xb   :  { %17 = dma.vmem_to_smem %s15_s29, 16, %s2196_s9, [#allocation2] }
   0xc   :  { %2190 = dma.done.wait [#allocation2], 16 }
   0xd   :  { %2191 = vsyncadd [#allocation2], 4294967280 }
   0xe   :  { %19 = sfence }
   0xf   :  { %20 = vsyncpa [#allocation5], 0  ;;  %v38_v0 = vld [vmem:[%s2581_s3] sm:$0xff]  ;;  %v39_v1 = vld [vmem:[%s2581_s3 + $0x8] sm:$0xff]  ;;  %v2197_v3 = vmov 0.0|0.0   ;;  %vm2198_vm0 = vmmov 0  }
  0x10   :  { %v40_v2 = vld [vmem:[%s2581_s3 + $0x10] sm:$0xff]  ;;  %1949 = vmatprep.subr.bf16.mxu0 %v2197_v3  ;;  %v2263_v4 = vpack.c.bf16 %v39_v1, %v38_v0  ;;  %v41_v5 = vld [vmem:[%s2581_s3 + $0x18] sm:$0xff]  ;;  %v2199_v6 = vmov 0.0   ;;  %1955 = vmatprep.subr.bf16.mxu1 %v2197_v3 }
  0x11   :  { %1781 = vmatprep.mubr.msk.f32.mxu0 %vm2198_vm0, %v2199_v6  ;;  %1792 = vmatprep.mubr.msk.f32.mxu1 %vm2198_vm0, %v2199_v6 }
  0x12   :  { %21 = vsyncpa [#allocation7], 0  ;;  %1951 = vmatpush3.bf16.msra.mxu0 %v2263_v4  ;;  %v2274_v7 = vpack.c.bf16 %v41_v5, %v40_v2  ;;  %v34_v8 = vld [vmem:[%s2580_s2] sm:$0x1]  ;;  %vm43_vm1 = vcmask 261120   ;;  %s2200_s2 = smov 64   ;;  %v141_v23 = vlaneseq }
  0x13   :  { %1952 = vmatprep.subr.bf16.mxu0 %v2197_v3  ;;  %v42_v9 = vld [vmem:[%s2582_s4] sm:$0x1]  ;;  %s35_s20 = sld [smem:[#allocation3]]  ;;  %v151_v26 = vld [vmem:[%s2583_s5 + $0x8] sm:$0xff]  ;;  %v152_v27 = vld [vmem:[%s2583_s5 + $0x10] sm:$0xff]  ;;  %s2201_s10 = smov 96  }
  0x14   :  { %v142_v24 = vshrl.u32 %v141_v23, 7  ;;  %v150_v25 = vld [vmem:[%s2583_s5] sm:$0xff]  ;;  %v153_v30 = vld [vmem:[%s2583_s5 + $0x18] sm:$0xff]  ;;  %s2202_s11 = smov 32   ;;  %s1665_s0 = sld [smem:[#allocation3 + $0x1]]  ;;  %vm230_vm2 = vcmask 1040384  }
  0x15   :  { %v2306_v29 = vpack.c.bf16 %v151_v26, %v150_v25  ;;  %v2312_v31 = vpack.c.bf16 %v153_v30, %v152_v27  ;;  %v251_v41 = vld [vmem:[%s2582_s4] sm:$0x1]  ;;  %s1669_s17 = sld [smem:[#allocation3 + $0x2]]  ;;  %s1677_s29 = sld [smem:[#allocation3 + $0x4]]  ;;  %vm1624_vm3 = vcmask 253952  }
  0x16   :  { %1954 = vmatpush3.bf16.msra.mxu0 %v2274_v7  ;;  %v143_v28 = vsub.s32 0, %v142_v24  ;;  %v448_v0 = vld [vmem:[%s2582_s4] sm:$0x1] }
  0x17   :  { %1961 = vmatprep.subr.bf16.mxu0 %v2197_v3  ;;  %1957 = vmatpush3.bf16.msra.mxu1 %v2306_v29  ;;  %v645_v27 = vld [vmem:[%s2582_s4] sm:$0x1] }
  0x18   :  { %1958 = vmatprep.subr.bf16.mxu1 %v2197_v3  ;;  %v144_v33 = vrot.slane %v34_v8, %v143_v28 }
  0x19   :  { %1782 = vmatmul.mubr.msk.f32.vlgmr.msra.gmra.mrb[0].mxu0 %vm43_vm1, %v34_v8  ;;  %s36_s23 = scalar_lea.vmem %s2579_s1, %s35_s20 }
  0x1a   :  { %1963 = vmatpush3.bf16.msra.mxu0 %v2263_v4  ;;  %1803 = vmatprep.mubr.msk.f32.mxu0 %vm2198_vm0, %v2199_v6  ;;  %v37_v13 = vld [vmem:[%s36_s23] sm:$0x1]  ;;  %s245_s15 = scalar_lea.vmem %s2579_s1, %s1665_s0  ;;  %s1673_s23 = sld [smem:[#allocation3 + $0x3]] }
  0x1b   :  { %1964 = vmatprep.subr.bf16.mxu0 %v2197_v3  ;;  %1960 = vmatpush3.bf16.msra.mxu1 %v2312_v31  ;;  %v246_v47 = vld [vmem:[%s245_s15] sm:$0x1]  ;;  %s442_s20 = scalar_lea.vmem %s2579_s1, %s1669_s17  ;;  %s1681_s0 = sld [smem:[#allocation3 + $0x5]] }
  0x1c   :  { %1967 = vmatprep.subr.bf16.mxu1 %v2197_v3  ;;  %s1685_s17 = sld [smem:[#allocation3 + $0x6]] }
  0x1e   :  { %1966 = vmatpush3.bf16.msra.mxu0 %v2274_v7 }
  0x1f   :  { %1973 = vmatprep.subr.bf16.mxu0 %v2197_v3 }
  0x20   :  { %s639_s26 = scalar_lea.vmem %s2579_s1, %s1673_s23  ;;  %s1689_s23 = sld [smem:[#allocation3 + $0x7]] }
  0x21   :  { %s1033_s15 = scalar_lea.vmem %s2579_s1, %s1681_s0 }
  0xec   :  { %v113_v10 = vpop.f32.mrb[0].mxu0 }
  0xed   :  { %v114_v11 = vadd.f32 %v113_v10, %v42_v9  ;;  %v1783_v12 = vpop.f32.mrb[1].mxu0  ;;  %v443_v10 = vld [vmem:[%s442_s20] sm:$0x1]  ;;  %s1230_s20 = scalar_lea.vmem %s2579_s1, %s1685_s17 }
  0xef   :  { %125 = vrot.lane.b32.xlu0 %v114_v11, %s2200_s2  ;;  %v117_v14 = vadd.f32 %v114_v11, %v37_v13 }
  0xf1   :  { %v1663_v15 = vmul.f32 -1.442695, %v117_v14 }
  0xf3   :  { %2054 = vpow2.f32 %v1663_v15 }
  0xfd   :  { %v2055_v16 = vpop.eup %2054 }
  0xfe   :  { %v121_v17 = vadd.f32 1.0, %v2055_v16 }
 0x100   :  { %2056 = vrcp.f32 %v121_v17 }
 0x10a   :  { %v2057_v18 = vpop.eup %2056 }
 0x10b   :  { %v135_v35 = vsub.f32 1.0, %v2057_v18 }
 0x161   :  { %v126_v19 = vpop.permute.xlu0 %125 }
 0x162   :  { %v128_v20 = vmul.f32 %v2057_v18, %v126_v19 }
 0x164   :  { %130 = vrot.lane.b32.xlu0 %v128_v20, %s2200_s2 }
 0x1d6   :  { %v131_v21 = vpop.permute.xlu0 %130 }
 0x1d7   :  { %v133_v22 = vadd.f32 %v131_v21, %v37_v13 }
 0x1d9   :  { %2058 = vtanh.f32 %v133_v22 }
 0x1e3   :  { %v2059_v32 = vpop.eup %2058 }
 0x1e4   :  { %137 = vrot.lane.b32.xlu1 %v2059_v32, %s2201_s10 }
 0x1e8   :  { %145 = vrot.lane.b32.xlu1 %v144_v33, %s2202_s11  ;;  %s836_s11 = scalar_lea.vmem %s2579_s1, %s1677_s29 }
 0x256   :  { %v138_v34 = vpop.permute.xlu1 %137 }
 0x257   :  { %v140_v37 = vmul.f32 %v138_v34, %v135_v35  ;;  %v640_v35 = vld [vmem:[%s639_s26] sm:$0x1]  ;;  %s1427_s26 = scalar_lea.vmem %s2579_s1, %s1689_s23 }
 0x25a   :  { %v146_v36 = vpop.permute.xlu1 %145 }
 0x25b   :  { %v148_v38 = vmul.f32 %v2057_v18, %v146_v36 }
 0x25d   :  { %v149_v39 = vadd.f32 %v148_v38, %v140_v37 }
 0x25f   :  { %156 = vrot.lane.b32.xlu0 %v149_v39, %s2201_s10 }
 0x2d1   :  { %v157_v40 = vpop.permute.xlu0 %156 }
 0x2d2   :  { %1793 = vmatmul.mubr.msk.f32.vlgmr.msra.gmra.mrb[0].mxu1 %vm43_vm1, %v157_v40  ;;  %1804 = vmatmul.mubr.msk.f32.vlgmr.msra.gmra.mrb[2].mxu0 %vm43_vm1, %v157_v40 }
 0x2d3   :  { %1969 = vmatpush3.bf16.msra.mxu1 %v2306_v29  ;;  %1975 = vmatpush3.bf16.msra.mxu0 %v2263_v4 }
 0x2d4   :  { %1970 = vmatprep.subr.bf16.mxu1 %v2197_v3  ;;  %1976 = vmatprep.subr.bf16.mxu0 %v2197_v3 }
 0x2d5   :  { %1814 = vmatprep.mubr.msk.f32.mxu1 %vm2198_vm0, %v2199_v6  ;;  %1825 = vmatprep.mubr.msk.f32.mxu0 %vm2198_vm0, %v2199_v6 }
 0x2d7   :  { %1972 = vmatpush3.bf16.msra.mxu1 %v2312_v31  ;;  %1978 = vmatpush3.bf16.msra.mxu0 %v2274_v7 }
 0x2d8   :  { %1979 = vmatprep.subr.bf16.mxu1 %v2197_v3  ;;  %1985 = vmatprep.subr.bf16.mxu0 %v2197_v3 }
 0x3a5   :  { %v2336_v42 = vpop.f32.mrb[0].mxu1  ;;  %v318_v43 = vpop.f32.mrb[2].mxu0 }
 0x3a6   :  { %v319_v44 = vadd.f32 %v318_v43, %v251_v41  ;;  %v1794_v45 = vpop.f32.mrb[1].mxu1  ;;  %v1805_v46 = vpop.f32.mrb[3].mxu0 }
 0x3a8   :  { %330 = vrot.lane.b32.xlu1 %v319_v44, %s2200_s2  ;;  %v322_v48 = vadd.f32 %v319_v44, %v246_v47 }
 0x3aa   :  { %v1667_v49 = vmul.f32 -1.442695, %v322_v48 }
 0x3ac   :  { %2060 = vpow2.f32 %v1667_v49 }
 0x3b6   :  { %v2061_v50 = vpop.eup %2060 }
 0x3b7   :  { %v326_v51 = vadd.f32 1.0, %v2061_v50 }
 0x3b9   :  { %2062 = vrcp.f32 %v326_v51 }
 0x3c3   :  { %v2063_v52 = vpop.eup %2062 }
 0x3c4   :  { %v340_v58 = vsub.f32 1.0, %v2063_v52  ;;  %v346_v60 = vmul.f32 %v2063_v52, %v149_v39 }
 0x41a   :  { %v331_v53 = vpop.permute.xlu1 %330 }
 0x41b   :  { %v333_v54 = vmul.f32 %v2063_v52, %v331_v53  ;;  %v842_v53 = vld [vmem:[%s2582_s4] sm:$0x1] }
 0x41d   :  { %335 = vrot.lane.b32.xlu0 %v333_v54, %s2200_s2 }
 0x48f   :  { %v336_v55 = vpop.permute.xlu0 %335 }
 0x490   :  { %v338_v56 = vadd.f32 %v336_v55, %v246_v47 }
 0x492   :  { %2064 = vtanh.f32 %v338_v56 }
 0x49c   :  { %v2065_v57 = vpop.eup %2064 }
 0x49d   :  { %342 = vrot.lane.b32.xlu1 %v2065_v57, %s2201_s10 }
 0x50f   :  { %v343_v59 = vpop.permute.xlu1 %342 }
 0x510   :  { %v345_v61 = vmul.f32 %v343_v59, %v340_v58  ;;  %v837_v59 = vld [vmem:[%s836_s11] sm:$0x1] }
 0x512   :  { %v347_v62 = vadd.f32 %v346_v60, %v345_v61 }
 0x514   :  { %354 = vrot.lane.b32.xlu0 %v347_v62, %s2201_s10 }
 0x586   :  { %v355_v63 = vpop.permute.xlu0 %354 }
 0x587   :  { %1815 = vmatmul.mubr.msk.f32.vlgmr.msra.gmra.mrb[2].mxu1 %vm43_vm1, %v355_v63  ;;  %1826 = vmatmul.mubr.msk.f32.vlgmr.msra.gmra.mrb[4].mxu0 %vm43_vm1, %v355_v63 }
 0x588   :  { %1981 = vmatpush3.bf16.msra.mxu1 %v2306_v29  ;;  %1987 = vmatpush3.bf16.msra.mxu0 %v2263_v4 }
 0x589   :  { %1982 = vmatprep.subr.bf16.mxu1 %v2197_v3  ;;  %1988 = vmatprep.subr.bf16.mxu0 %v2197_v3 }
 0x58a   :  { %1836 = vmatprep.mubr.msk.f32.mxu1 %vm2198_vm0, %v2199_v6  ;;  %1847 = vmatprep.mubr.msk.f32.mxu0 %vm2198_vm0, %v2199_v6 }
 0x58c   :  { %1984 = vmatpush3.bf16.msra.mxu1 %v2312_v31  ;;  %1990 = vmatpush3.bf16.msra.mxu0 %v2274_v7 }
 0x58d   :  { %1991 = vmatprep.subr.bf16.mxu1 %v2197_v3  ;;  %1997 = vmatprep.subr.bf16.mxu0 %v2197_v3 }
 0x65a   :  { %v2362_v1 = vpop.f32.mrb[2].mxu1  ;;  %v515_v2 = vpop.f32.mrb[4].mxu0 }
 0x65b   :  { %v516_v5 = vadd.f32 %v515_v2, %v448_v0  ;;  %v1816_v8 = vpop.f32.mrb[3].mxu1  ;;  %v1827_v9 = vpop.f32.mrb[5].mxu0 }
 0x65d   :  { %527 = vrot.lane.b32.xlu1 %v516_v5, %s2200_s2  ;;  %v519_v11 = vadd.f32 %v516_v5, %v443_v10 }
 0x65f   :  { %v1671_v12 = vmul.f32 -1.442695, %v519_v11 }
 0x661   :  { %2066 = vpow2.f32 %v1671_v12 }
 0x66b   :  { %v2067_v13 = vpop.eup %2066 }
 0x66c   :  { %v523_v14 = vadd.f32 1.0, %v2067_v13 }
 0x66e   :  { %2068 = vrcp.f32 %v523_v14 }
 0x678   :  { %v2069_v15 = vpop.eup %2068 }
 0x679   :  { %v537_v21 = vsub.f32 1.0, %v2069_v15  ;;  %v543_v23 = vmul.f32 %v2069_v15, %v347_v62 }
 0x6cf   :  { %v528_v16 = vpop.permute.xlu1 %527 }
 0x6d0   :  { %v530_v17 = vmul.f32 %v2069_v15, %v528_v16 }
 0x6d2   :  { %532 = vrot.lane.b32.xlu0 %v530_v17, %s2200_s2  ;;  %v1039_v17 = vld [vmem:[%s2582_s4] sm:$0x1] }
 0x744   :  { %v533_v18 = vpop.permute.xlu0 %532 }
 0x745   :  { %v535_v19 = vadd.f32 %v533_v18, %v443_v10 }
 0x747   :  { %2070 = vtanh.f32 %v535_v19 }
 0x751   :  { %v2071_v20 = vpop.eup %2070 }
 0x752   :  { %539 = vrot.lane.b32.xlu1 %v2071_v20, %s2201_s10 }
 0x7c4   :  { %v540_v22 = vpop.permute.xlu1 %539 }
 0x7c5   :  { %v542_v24 = vmul.f32 %v540_v22, %v537_v21 }
 0x7c7   :  { %v544_v25 = vadd.f32 %v543_v23, %v542_v24  ;;  %v1034_v23 = vld [vmem:[%s1033_s15] sm:$0x1] }
 0x7c9   :  { %551 = vrot.lane.b32.xlu0 %v544_v25, %s2201_s10 }
 0x83b   :  { %v552_v26 = vpop.permute.xlu0 %551 }
 0x83c   :  { %1837 = vmatmul.mubr.msk.f32.vlgmr.msra.gmra.mrb[4].mxu1 %vm43_vm1, %v552_v26  ;;  %1848 = vmatmul.mubr.msk.f32.vlgmr.msra.gmra.mrb[6].mxu0 %vm43_vm1, %v552_v26 }
 0x83d   :  { %1993 = vmatpush3.bf16.msra.mxu1 %v2306_v29  ;;  %1999 = vmatpush3.bf16.msra.mxu0 %v2263_v4 }
 0x83e   :  { %1994 = vmatprep.subr.bf16.mxu1 %v2197_v3  ;;  %2000 = vmatprep.subr.bf16.mxu0 %v2197_v3 }
 0x83f   :  { %1858 = vmatprep.mubr.msk.f32.mxu1 %vm2198_vm0, %v2199_v6  ;;  %1869 = vmatprep.mubr.msk.f32.mxu0 %vm2198_vm0, %v2199_v6 }
 0x841   :  { %1996 = vmatpush3.bf16.msra.mxu1 %v2312_v31  ;;  %2002 = vmatpush3.bf16.msra.mxu0 %v2274_v7 }
 0x842   :  { %2003 = vmatprep.subr.bf16.mxu1 %v2197_v3  ;;  %2009 = vmatprep.subr.bf16.mxu0 %v2197_v3 }
 0x90f   :  { %v2388_v28 = vpop.f32.mrb[4].mxu1  ;;  %v712_v30 = vpop.f32.mrb[6].mxu0 }
 0x910   :  { %v713_v32 = vadd.f32 %v712_v30, %v645_v27  ;;  %v1838_v33 = vpop.f32.mrb[5].mxu1  ;;  %v1849_v34 = vpop.f32.mrb[7].mxu0 }
 0x912   :  { %724 = vrot.lane.b32.xlu1 %v713_v32, %s2200_s2  ;;  %v716_v36 = vadd.f32 %v713_v32, %v640_v35 }
 0x914   :  { %v1675_v37 = vmul.f32 -1.442695, %v716_v36 }
 0x916   :  { %2072 = vpow2.f32 %v1675_v37 }
 0x920   :  { %v2073_v38 = vpop.eup %2072 }
 0x921   :  { %v720_v39 = vadd.f32 1.0, %v2073_v38 }
 0x923   :  { %2074 = vrcp.f32 %v720_v39 }
 0x92d   :  { %v2075_v40 = vpop.eup %2074 }
 0x92e   :  { %v734_v47 = vsub.f32 1.0, %v2075_v40  ;;  %v740_v49 = vmul.f32 %v2075_v40, %v544_v25 }
 0x984   :  { %v725_v41 = vpop.permute.xlu1 %724 }
 0x985   :  { %v727_v43 = vmul.f32 %v2075_v40, %v725_v41 }
 0x987   :  { %729 = vrot.lane.b32.xlu0 %v727_v43, %s2200_s2 }
 0x9f9   :  { %v730_v44 = vpop.permute.xlu0 %729 }
 0x9fa   :  { %v732_v45 = vadd.f32 %v730_v44, %v640_v35 }
 0x9fc   :  { %2076 = vtanh.f32 %v732_v45 }
 0xa06   :  { %v2077_v46 = vpop.eup %2076 }
 0xa07   :  { %736 = vrot.lane.b32.xlu1 %v2077_v46, %s2201_s10 }
 0xa79   :  { %v737_v48 = vpop.permute.xlu1 %736 }
 0xa7a   :  { %v739_v50 = vmul.f32 %v737_v48, %v734_v47 }
 0xa7c   :  { %v741_v51 = vadd.f32 %v740_v49, %v739_v50 }
 0xa7e   :  { %748 = vrot.lane.b32.xlu0 %v741_v51, %s2201_s10 }
 0xaf0   :  { %v749_v52 = vpop.permute.xlu0 %748 }
 0xaf1   :  { %1859 = vmatmul.mubr.msk.f32.vlgmr.msra.gmra.mrb[6].mxu1 %vm43_vm1, %v749_v52  ;;  %1870 = vmatmul.mubr.msk.f32.vlgmr.msra.gmra.mrb[8].mxu0 %vm43_vm1, %v749_v52 }
 0xaf2   :  { %2005 = vmatpush3.bf16.msra.mxu1 %v2306_v29  ;;  %2011 = vmatpush3.bf16.msra.mxu0 %v2263_v4 }
 0xaf3   :  { %2006 = vmatprep.subr.bf16.mxu1 %v2197_v3  ;;  %2012 = vmatprep.subr.bf16.mxu0 %v2197_v3 }
 0xaf4   :  { %1880 = vmatprep.mubr.msk.f32.mxu1 %vm2198_vm0, %v2199_v6  ;;  %1891 = vmatprep.mubr.msk.f32.mxu0 %vm2198_vm0, %v2199_v6 }
 0xaf6   :  { %2008 = vmatpush3.bf16.msra.mxu1 %v2312_v31  ;;  %2014 = vmatpush3.bf16.msra.mxu0 %v2274_v7 }
 0xaf7   :  { %2015 = vmatprep.subr.bf16.mxu1 %v2197_v3  ;;  %2021 = vmatprep.subr.bf16.mxu0 %v2197_v3 }
 0xbc4   :  { %v2414_v54 = vpop.f32.mrb[6].mxu1  ;;  %v909_v55 = vpop.f32.mrb[8].mxu0 }
 0xbc5   :  { %v910_v56 = vadd.f32 %v909_v55, %v842_v53  ;;  %v1860_v57 = vpop.f32.mrb[7].mxu1  ;;  %v1871_v58 = vpop.f32.mrb[9].mxu0 }
 0xbc7   :  { %921 = vrot.lane.b32.xlu1 %v910_v56, %s2200_s2  ;;  %v913_v60 = vadd.f32 %v910_v56, %v837_v59 }
 0xbc9   :  { %v1679_v61 = vmul.f32 -1.442695, %v913_v60 }
 0xbcb   :  { %2078 = vpow2.f32 %v1679_v61 }
 0xbd5   :  { %v2079_v62 = vpop.eup %2078 }
 0xbd6   :  { %v917_v63 = vadd.f32 1.0, %v2079_v62 }
 0xbd8   :  { %2080 = vrcp.f32 %v917_v63 }
 0xbe2   :  { %v2081_v0 = vpop.eup %2080 }
 0xbe3   :  { %v931_v11 = vsub.f32 1.0, %v2081_v0  ;;  %v937_v13 = vmul.f32 %v2081_v0, %v741_v51 }
 0xc39   :  { %v922_v2 = vpop.permute.xlu1 %921 }
 0xc3a   :  { %v924_v5 = vmul.f32 %v2081_v0, %v922_v2 }
 0xc3c   :  { %926 = vrot.lane.b32.xlu0 %v924_v5, %s2200_s2  ;;  %v1433_v5 = vld [vmem:[%s2582_s4] sm:$0x1] }
 0xcae   :  { %v927_v8 = vpop.permute.xlu0 %926 }
 0xcaf   :  { %v929_v9 = vadd.f32 %v927_v8, %v837_v59 }
 0xcb1   :  { %2082 = vtanh.f32 %v929_v9 }
 0xcbb   :  { %v2083_v10 = vpop.eup %2082 }
 0xcbc   :  { %933 = vrot.lane.b32.xlu1 %v2083_v10, %s2201_s10 }
 0xd2e   :  { %v934_v12 = vpop.permute.xlu1 %933 }
 0xd2f   :  { %v936_v14 = vmul.f32 %v934_v12, %v931_v11 }
 0xd31   :  { %v938_v15 = vadd.f32 %v937_v13, %v936_v14 }
 0xd33   :  { %945 = vrot.lane.b32.xlu0 %v938_v15, %s2201_s10 }
 0xda5   :  { %v946_v16 = vpop.permute.xlu0 %945 }
 0xda6   :  { %1881 = vmatmul.mubr.msk.f32.vlgmr.msra.gmra.mrb[8].mxu1 %vm43_vm1, %v946_v16  ;;  %1892 = vmatmul.mubr.msk.f32.vlgmr.msra.gmra.mrb[10].mxu0 %vm43_vm1, %v946_v16 }
 0xda7   :  { %2017 = vmatpush3.bf16.msra.mxu1 %v2306_v29  ;;  %2023 = vmatpush3.bf16.msra.mxu0 %v2263_v4 }
 0xda8   :  { %2018 = vmatprep.subr.bf16.mxu1 %v2197_v3  ;;  %2024 = vmatprep.subr.bf16.mxu0 %v2197_v3 }
 0xda9   :  { %1902 = vmatprep.mubr.msk.f32.mxu1 %vm2198_vm0, %v2199_v6  ;;  %1913 = vmatprep.mubr.msk.f32.mxu0 %vm2198_vm0, %v2199_v6 }
 0xdab   :  { %2020 = vmatpush3.bf16.msra.mxu1 %v2312_v31  ;;  %2026 = vmatpush3.bf16.msra.mxu0 %v2274_v7 }
 0xdac   :  { %2027 = vmatprep.subr.bf16.mxu1 %v2197_v3  ;;  %2033 = vmatprep.subr.bf16.mxu0 %v2197_v3 }
 0xe79   :  { %v2440_v18 = vpop.f32.mrb[8].mxu1  ;;  %v1106_v19 = vpop.f32.mrb[10].mxu0 }
 0xe7a   :  { %v1107_v20 = vadd.f32 %v1106_v19, %v1039_v17  ;;  %v1882_v21 = vpop.f32.mrb[9].mxu1  ;;  %v1893_v22 = vpop.f32.mrb[11].mxu0 }
 0xe7b   :  { %v154_v21 = vld [vmem:[%s2584_s6] sm:$0x1] }
 0xe7c   :  { %1118 = vrot.lane.b32.xlu1 %v1107_v20, %s2200_s2  ;;  %v1110_v24 = vadd.f32 %v1107_v20, %v1034_v23  ;;  %v227_v22 = vadd.f32 %v2336_v42, %v154_v21 }
 0xe7e   :  { %v1683_v25 = vmul.f32 -1.442695, %v1110_v24 }
 0xe80   :  { %2084 = vpow2.f32 %v1683_v25 }
 0xe8a   :  { %v2085_v26 = vpop.eup %2084 }
 0xe8b   :  { %v1114_v27 = vadd.f32 1.0, %v2085_v26 }
 0xe8d   :  { %2086 = vrcp.f32 %v1114_v27 }
 0xe97   :  { %v2087_v30 = vpop.eup %2086 }
 0xe98   :  { %v1128_v37 = vsub.f32 1.0, %v2087_v30  ;;  %v1134_v39 = vmul.f32 %v2087_v30, %v938_v15 }
 0xeee   :  { %v1119_v32 = vpop.permute.xlu1 %1118 }
 0xeef   :  { %v1121_v33 = vmul.f32 %v2087_v30, %v1119_v32 }
 0xef1   :  { %1123 = vrot.lane.b32.xlu0 %v1121_v33, %s2200_s2 }
 0xf63   :  { %v1124_v34 = vpop.permute.xlu0 %1123 }
 0xf64   :  { %v1126_v35 = vadd.f32 %v1124_v34, %v1034_v23  ;;  %v231_v23 = vsel %vm230_vm2, %v227_v22, -inf }
 0xf66   :  { %2088 = vtanh.f32 %v1126_v35  ;;  %v352_v35 = vld [vmem:[%s2584_s6] sm:$0x1] }
 0xf70   :  { %v2089_v36 = vpop.eup %2088 }
 0xf71   :  { %1130 = vrot.lane.b32.xlu1 %v2089_v36, %s2201_s10  ;;  %v425_v36 = vadd.f32 %v2362_v1, %v352_v35 }
 0xfe3   :  { %v1131_v38 = vpop.permute.xlu1 %1130 }
 0xfe4   :  { %v1133_v40 = vmul.f32 %v1131_v38, %v1128_v37  ;;  %v549_v38 = vld [vmem:[%s2584_s6] sm:$0x1] }
 0xfe6   :  { %v1135_v41 = vadd.f32 %v1134_v39, %v1133_v40  ;;  %v622_v39 = vadd.f32 %v2388_v28, %v549_v38  ;;  %v428_v40 = vsel %vm230_vm2, %v425_v36, -inf }
 0xfe8   :  { %1142 = vrot.lane.b32.xlu0 %v1135_v41, %s2201_s10  ;;  %v625_v1 = vsel %vm230_vm2, %v622_v39, -inf }
0x105a   :  { %v1143_v43 = vpop.permute.xlu0 %1142 }
0x105b   :  { %1903 = vmatmul.mubr.msk.f32.vlgmr.msra.gmra.mrb[10].mxu1 %vm43_vm1, %v1143_v43  ;;  %1914 = vmatmul.mubr.msk.f32.vlgmr.msra.gmra.mrb[12].mxu0 %vm43_vm1, %v1143_v43 }
0x105c   :  { %2029 = vmatpush3.bf16.msra.mxu1 %v2306_v29  ;;  %2035 = vmatpush3.bf16.msra.mxu0 %v2263_v4  ;;  %v1236_v4 = vld [vmem:[%s2582_s4] sm:$0x1] }
0x105d   :  { %2030 = vmatprep.subr.bf16.mxu1 %v2197_v3  ;;  %2036 = vmatprep.subr.bf16.mxu0 %v2197_v3 }
0x105e   :  { %1924 = vmatprep.mubr.msk.f32.mxu1 %vm2198_vm0, %v2199_v6  ;;  %1935 = vmatprep.mubr.msk.f32.mxu0 %vm2198_vm0, %v2199_v6 }
0x1060   :  { %2032 = vmatpush3.bf16.msra.mxu1 %v2312_v31  ;;  %2038 = vmatpush3.bf16.msra.mxu0 %v2274_v7  ;;  %v1231_v7 = vld [vmem:[%s1230_s20] sm:$0x1] }
0x1061   :  { %2039 = vmatprep.subr.bf16.mxu1 %v2197_v3 }
0x112e   :  { %v2465_v44 = vpop.f32.mrb[10].mxu1  ;;  %v1303_v45 = vpop.f32.mrb[12].mxu0 }
0x112f   :  { %v1304_v46 = vadd.f32 %v1303_v45, %v1236_v4  ;;  %v1904_v47 = vpop.f32.mrb[11].mxu1  ;;  %v1915_v48 = vpop.f32.mrb[13].mxu0  ;;  %v943_v4 = vld [vmem:[%s2584_s6] sm:$0x1] }
0x1130   :  { %v1016_v45 = vadd.f32 %v2440_v18, %v943_v4 }
0x1131   :  { %1315 = vrot.lane.b32.xlu1 %v1304_v46, %s2200_s2  ;;  %v1307_v49 = vadd.f32 %v1304_v46, %v1231_v7  ;;  %v1337_v46 = vld [vmem:[%s2584_s6] sm:$0x1] }
0x1132   :  { %v1019_v48 = vsel %vm230_vm2, %v1016_v45, -inf }
0x1133   :  { %v1687_v50 = vmul.f32 -1.442695, %v1307_v49 }
0x1135   :  { %2090 = vpow2.f32 %v1687_v50 }
0x113f   :  { %v2091_v51 = vpop.eup %2090 }
0x1140   :  { %v1311_v52 = vadd.f32 1.0, %v2091_v51 }
0x1142   :  { %2092 = vrcp.f32 %v1311_v52 }
0x114c   :  { %v2093_v53 = vpop.eup %2092 }
0x114d   :  { %v1325_v60 = vsub.f32 1.0, %v2093_v53  ;;  %v1331_v62 = vmul.f32 %v2093_v53, %v1135_v41  ;;  %v746_v41 = vld [vmem:[%s2584_s6] sm:$0x1] }
0x114e   :  { %v819_v43 = vadd.f32 %v2414_v54, %v746_v41 }
0x1150   :  { %v822_v28 = vsel %vm230_vm2, %v819_v43, -inf }
0x11a3   :  { %v1316_v55 = vpop.permute.xlu1 %1315 }
0x11a4   :  { %v1318_v56 = vmul.f32 %v2093_v53, %v1316_v55 }
0x11a6   :  { %1320 = vrot.lane.b32.xlu0 %v1318_v56, %s2200_s2 }
0x1218   :  { %v1321_v57 = vpop.permute.xlu0 %1320 }
0x1219   :  { %v1323_v58 = vadd.f32 %v1321_v57, %v1231_v7 }
0x121b   :  { %2094 = vtanh.f32 %v1323_v58 }
0x1225   :  { %v2095_v59 = vpop.eup %2094 }
0x1226   :  { %1327 = vrot.lane.b32.xlu1 %v2095_v59, %s2201_s10 }
0x1298   :  { %v1328_v61 = vpop.permute.xlu1 %1327 }
0x1299   :  { %v1330_v63 = vmul.f32 %v1328_v61, %v1325_v60 }
0x129b   :  { %v1332_v0 = vadd.f32 %v1331_v62, %v1330_v63 }
0x129d   :  { %1339 = vrot.lane.b32.xlu0 %v1332_v0, %s2201_s10 }
0x130f   :  { %v1340_v2 = vpop.permute.xlu0 %1339 }
0x1310   :  { %1925 = vmatmul.mubr.msk.f32.vlgmr.msra.gmra.mrb[12].mxu1 %vm43_vm1, %v1340_v2  ;;  %1936 = vmatmul.mubr.msk.f32.vlgmr.msra.gmra.mrb[14].mxu0 %vm43_vm1, %v1340_v2 }
0x1311   :  { %2041 = vmatpush3.bf16.msra.mxu1 %v2306_v29  ;;  %1946 = vmatprep.mubr.msk.f32.mxu1 %vm2198_vm0, %v2199_v6  ;;  %v1428_v6 = vld [vmem:[%s1427_s26] sm:$0x1] }
0x1312   :  { %2042 = vmatprep.subr.bf16.mxu1 %v2197_v3 }
0x1315   :  { %2044 = vmatpush3.bf16.msra.mxu1 %v2312_v31 }
0x13e3   :  { %v1409_v8 = vpop.f32.mrb[12].mxu1  ;;  %v1500_v9 = vpop.f32.mrb[14].mxu0 }
0x13e4   :  { %v1501_v10 = vadd.f32 %v1500_v9, %v1433_v5  ;;  %v1926_v11 = vpop.f32.mrb[13].mxu1  ;;  %v1937_v12 = vpop.f32.mrb[15].mxu0  ;;  %v1410_v47 = vadd.f32 %v1409_v8, %v1337_v46 }
0x13e6   :  { %1512 = vrot.lane.b32.xlu1 %v1501_v10, %s2200_s2  ;;  %v1504_v3 = vadd.f32 %v1501_v10, %v1428_v6  ;;  %v1413_v54 = vsel %vm230_vm2, %v1410_v47, -inf }
0x13e8   :  { %v1691_v29 = vmul.f32 -1.442695, %v1504_v3 }
0x13ea   :  { %2096 = vpow2.f32 %v1691_v29 }
0x13f4   :  { %v2097_v31 = vpop.eup %2096 }
0x13f5   :  { %v1508_v13 = vadd.f32 1.0, %v2097_v31 }
0x13f7   :  { %2098 = vrcp.f32 %v1508_v13 }
0x1401   :  { %v2099_v14 = vpop.eup %2098 }
0x1402   :  { %v1522_v24 = vsub.f32 1.0, %v2099_v14  ;;  %v1528_v26 = vmul.f32 %v2099_v14, %v1332_v0 }
0x1458   :  { %v1513_v15 = vpop.permute.xlu1 %1512 }
0x1459   :  { %v1515_v16 = vmul.f32 %v2099_v14, %v1513_v15 }
0x145b   :  { %1517 = vrot.lane.b32.xlu0 %v1515_v16, %s2200_s2 }
0x14cd   :  { %v1518_v17 = vpop.permute.xlu0 %1517 }
0x14ce   :  { %v1520_v19 = vadd.f32 %v1518_v17, %v1428_v6  ;;  %v1140_v6 = vld [vmem:[%s2584_s6] sm:$0x1] }
0x14cf   :  { %v1213_v29 = vadd.f32 %v2465_v44, %v1140_v6 }
0x14d0   :  { %2100 = vtanh.f32 %v1520_v19  ;;  %v1534_v19 = vld [vmem:[%s2584_s6] sm:$0x1]  ;;  %s2203_s6 = smov [#allocation6]  }
0x14d1   :  { %v1216_v14 = vsel %vm230_vm2, %v1213_v29, -inf  ;;  %s1642_s16 = sshll.u32 %s2203_s6, 4  ;;  %s1643_s16 = int_to_ptr.vmem [resolvable:$true] %s1642_s16 }
0x14d2   :  { %s2146_s3 = scalar_lea.vmem %s1643_s16, 16  ;;  %s2150_s17 = scalar_lea.vmem %s1643_s16, 32 }
0x14d3   :  { %p2147_p5 = scmp.ne.s32.totalorder %s1643_s16, %s2146_s3  ;;  %p2151_p6 = scmp.lt.s32.totalorder %s1643_s16, %s1643_s16 }
0x14d4   :  { %p2152_p7 = scmp.lt.s32.totalorder %s2150_s17, %s2146_s3 }
0x14d6   :  { %p2153_p8 = por %p2152_p7, %p2151_p6 }
0x14d8   :  { %p2154_p9 = pnand %p2153_p8, %p2147_p5 }
0x14da   :  { %v2101_v20 = vpop.eup %2100 }
0x14db   :  { %1524 = vrot.lane.b32.xlu1 %v2101_v20, %s2201_s10 }
0x14ff   :  { %232 = vmax.xlane.f32.xlu1 %v231_v23 }
0x154d   :  { %v1525_v25 = vpop.permute.xlu1 %1524 }
0x154e   :  { %v1527_v27 = vmul.f32 %v1525_v25, %v1522_v24 }
0x1550   :  { %v1529_v30 = vadd.f32 %v1528_v26, %v1527_v27 }
0x1552   :  { %1536 = vrot.lane.b32.xlu0 %v1529_v30, %s2201_s10 }
0x158c   :  { %v233_v32 = vpop.xlane.xlu1 %232 }
0x158d   :  { %v234_v33 = vsub.f32 %v227_v22, %v233_v32 }
0x158f   :  { %v235_v34 = vmul.f32 1.442695, %v234_v33 }
0x1591   :  { %2102 = vpow2.f32 %v235_v34 }
0x159b   :  { %v2103_v42 = vpop.eup %2102 }
0x159c   :  { %v237_v37 = vsel %vm230_vm2, %v2103_v42, 0.0 }
0x159d   :  { %238 = vadd.xlane.f32.xlu0 %v237_v37 }
0x15a1   :  { %429 = vmax.xlane.f32.xlu0 %v428_v40 }
0x15a5   :  { %626 = vmax.xlane.f32.xlu0 %v625_v1 }
0x15a9   :  { %823 = vmax.xlane.f32.xlu0 %v822_v28 }
0x15ad   :  { %1020 = vmax.xlane.f32.xlu0 %v1019_v48 }
0x15b1   :  { %1414 = vmax.xlane.f32.xlu0 %v1413_v54 }
0x15c4   :  { %v1537_v7 = vpop.permute.xlu0 %1536 }
0x15c5   :  { %1947 = vmatmul.mubr.msk.f32.vlgmr.msra.gmra.mrb[14].mxu1 %vm43_vm1, %v1537_v7  ;;  %1625 = vst.msk [vmem:[#allocation6] sm:$0x1] %vm1624_vm3, %v1537_v7 }
0x162a   :  { %v239_v18 = vpop.xlane.xlu0 %238 }
0x162b   :  { %2104 = vlog2.f32 %v239_v18 }
0x162e   :  { %v430_v49 = vpop.xlane.xlu0 %429 }
0x162f   :  { %v2522_v50 = vsub.f32 %v425_v36, %v430_v49 }
0x1631   :  { %v432_v51 = vmul.f32 1.442695, %v2522_v50 }
0x1632   :  { %v627_v52 = vpop.xlane.xlu0 %626 }
0x1633   :  { %2106 = vpow2.f32 %v432_v51  ;;  %v2525_v53 = vsub.f32 %v622_v39, %v627_v52 }
0x1635   :  { %v2105_v55 = vpop.eup %2104  ;;  %v629_v56 = vmul.f32 1.442695, %v2525_v53 }
0x1636   :  { %v241_v57 = vmul.f32 0.6931472, %v2105_v55  ;;  %v824_v58 = vpop.xlane.xlu0 %823 }
0x1637   :  { %2108 = vpow2.f32 %v629_v56  ;;  %v2528_v59 = vsub.f32 %v819_v43, %v824_v58 }
0x1638   :  { %v242_v60 = vsub.f32 %v234_v33, %v241_v57 }
0x1639   :  { %v826_v61 = vmul.f32 1.442695, %v2528_v59 }
0x163a   :  { %243 = vst [vmem:[#allocation4] sm:$0x1] %v242_v60  ;;  %v1021_v62 = vpop.xlane.xlu0 %1020 }
0x163b   :  { %2110 = vpow2.f32 %v826_v61  ;;  %v2531_v63 = vsub.f32 %v1016_v45, %v1021_v62 }
0x163d   :  { %v2107_v0 = vpop.eup %2106  ;;  %v1023_v2 = vmul.f32 1.442695, %v2531_v63 }
0x163e   :  { %v1415_v5 = vpop.xlane.xlu0 %1414  ;;  %v434_v8 = vsel %vm230_vm2, %v2107_v0, 0.0 }
0x163f   :  { %2112 = vpow2.f32 %v1023_v2  ;;  %v1416_v9 = vsub.f32 %v1410_v47, %v1415_v5  ;;  %435 = vadd.xlane.f32.xlu1 %v434_v8 }
0x1641   :  { %v2109_v10 = vpop.eup %2108  ;;  %v1417_v11 = vmul.f32 1.442695, %v1416_v9 }
0x1642   :  { %v631_v12 = vsel %vm230_vm2, %v2109_v10, 0.0 }
0x1643   :  { %2114 = vpow2.f32 %v1417_v11  ;;  %632 = vadd.xlane.f32.xlu1 %v631_v12 }
0x1645   :  { %v2111_v3 = vpop.eup %2110 }
0x1646   :  { %v828_v31 = vsel %vm230_vm2, %v2111_v3, 0.0 }
0x1647   :  { %829 = vadd.xlane.f32.xlu1 %v828_v31 }
0x1649   :  { %v2113_v13 = vpop.eup %2112 }
0x164a   :  { %v1025_v15 = vsel %vm230_vm2, %v2113_v13, 0.0 }
0x164b   :  { %1217 = vmax.xlane.f32.xlu1 %v1216_v14  ;;  %1026 = vadd.xlane.f32.xlu0 %v1025_v15 }
0x164d   :  { %v2115_v16 = vpop.eup %2114 }
0x164e   :  { %v1419_v17 = vsel %vm230_vm2, %v2115_v16, 0.0 }
0x164f   :  { %1420 = vadd.xlane.f32.xlu0 %v1419_v17 }
0x1698   :  { %v1606_v20 = vpop.f32.mrb[14].mxu1 }
0x1699   :  { %v1607_v44 = vadd.f32 %v1606_v20, %v1534_v19  ;;  %v1948_v21 = vpop.f32.mrb[15].mxu1 }
0x169b   :  { %v1610_v22 = vsel %vm230_vm2, %v1607_v44, -inf }
0x169c   :  { %1611 = vmax.xlane.f32.xlu1 %v1610_v22 }
0x16cc   :  { %v436_v23 = vpop.xlane.xlu1 %435 }
0x16cd   :  { %2116 = vlog2.f32 %v436_v23 }
0x16d0   :  { %v633_v24 = vpop.xlane.xlu1 %632 }
0x16d1   :  { %2118 = vlog2.f32 %v633_v24 }
0x16d4   :  { %v830_v25 = vpop.xlane.xlu1 %829 }
0x16d5   :  { %2120 = vlog2.f32 %v830_v25 }
0x16d7   :  { %v2117_v26 = vpop.eup %2116 }
0x16d8   :  { %v438_v27 = vmul.f32 0.6931472, %v2117_v26  ;;  %v1218_v30 = vpop.xlane.xlu1 %1217  ;;  %v1027_v32 = vpop.xlane.xlu0 %1026 }
0x16d9   :  { %v1219_v33 = vsub.f32 %v1213_v29, %v1218_v30  ;;  %2122 = vlog2.f32 %v1027_v32 }
0x16da   :  { %v439_v34 = vsub.f32 %v2522_v50, %v438_v27 }
0x16db   :  { %v2119_v35 = vpop.eup %2118  ;;  %v1220_v42 = vmul.f32 1.442695, %v1219_v33 }
0x16dc   :  { %440 = vst [vmem:[#allocation4 + $0x1] sm:$0x1] %v439_v34  ;;  %v635_v36 = vmul.f32 0.6931472, %v2119_v35  ;;  %v1421_v37 = vpop.xlane.xlu0 %1420 }
0x16dd   :  { %2124 = vpow2.f32 %v1220_v42 }
0x16de   :  { %v636_v38 = vsub.f32 %v2525_v53, %v635_v36  ;;  %2126 = vlog2.f32 %v1421_v37 }
0x16df   :  { %v2121_v39 = vpop.eup %2120 }
0x16e0   :  { %637 = vst [vmem:[#allocation4 + $0x2] sm:$0x1] %v636_v38  ;;  %v832_v40 = vmul.f32 0.6931472, %v2121_v39 }
0x16e2   :  { %v833_v41 = vsub.f32 %v2528_v59, %v832_v40 }
0x16e3   :  { %v2123_v43 = vpop.eup %2122 }
0x16e4   :  { %834 = vst [vmem:[#allocation4 + $0x3] sm:$0x1] %v833_v41  ;;  %v1029_v1 = vmul.f32 0.6931472, %v2123_v43 }
0x16e6   :  { %v1030_v4 = vsub.f32 %v2531_v63, %v1029_v1 }
0x16e7   :  { %v2125_v45 = vpop.eup %2124 }
0x16e8   :  { %v2127_v28 = vpop.eup %2126  ;;  %1031 = vst [vmem:[#allocation4 + $0x4] sm:$0x1] %v1030_v4  ;;  %v1222_v46 = vsel %vm230_vm2, %v2125_v45, 0.0 }
0x16e9   :  { %v1423_v47 = vmul.f32 0.6931472, %v2127_v28  ;;  %1223 = vadd.xlane.f32.xlu1 %v1222_v46 }
0x16eb   :  { %v1424_v48 = vsub.f32 %v1416_v9, %v1423_v47 }
0x16ed   :  { %1425 = vst [vmem:[#allocation4 + $0x6] sm:$0x1] %v1424_v48 }
0x1729   :  { %v1612_v54 = vpop.xlane.xlu1 %1611 }
0x172a   :  { %v1613_v7 = vsub.f32 %v1607_v44, %v1612_v54 }
0x172c   :  { %v1614_v18 = vmul.f32 1.442695, %v1613_v7 }
0x172e   :  { %2128 = vpow2.f32 %v1614_v18 }
0x1738   :  { %v2129_v49 = vpop.eup %2128 }
0x1739   :  { %v1616_v50 = vsel %vm230_vm2, %v2129_v49, 0.0 }
0x173a   :  { %1617 = vadd.xlane.f32.xlu1 %v1616_v50 }
0x173b   :  { %2157 = shalt.err (!%p2154_p9)
}
0x173c   :  { %s2158_s20 = scalar_lea.hbm %s2586_s8, 16 }
0x173d   :  { %p2159_p10 = scmp.ne.s32.totalorder %s2586_s8, %s2158_s20  ;;  %p2162_p11 = scmp.lt.u32.totalorder %s2158_s20, %s2586_s8 }
0x173f   :  { %p2164_p12 = pnand %p2162_p11, %p2159_p10 }
0x1741   :  { %2167 = shalt.err (!%p2164_p12)
}
0x1742   :  { %1645 = dma.vmem_to_hbm [thread:$0]  %s1643_s16, 16, %s2586_s8, [#allocation7]  }
0x1743   :  { %s2204_s4 = smov [#allocation4]  }
0x1744   :  { %s1632_s1 = sshll.u32 %s2204_s4, 4  ;;  %s1633_s1 = int_to_ptr.vmem [resolvable:$true] %s1632_s1 }
0x1745   :  { %s2168_s2 = scalar_lea.vmem %s1633_s1, 128  ;;  %p2173_p0 = scmp.lt.s32.totalorder %s1633_s1, %s1633_s1 }
0x1746   :  { %p2169_p13 = scmp.ne.s32.totalorder %s1633_s1, %s2168_s2  ;;  %p2174_p1 = scmp.lt.s32.totalorder %s2168_s2, %s2168_s2 }
0x1748   :  { %p2175_p2 = por %p2174_p1, %p2173_p0 }
0x174a   :  { %p2176_p3 = pnand %p2175_p2, %p2169_p13 }
0x1776   :  { %v1224_v51 = vpop.xlane.xlu1 %1223 }
0x1777   :  { %2130 = vlog2.f32 %v1224_v51 }
0x1781   :  { %v2131_v52 = vpop.eup %2130 }
0x1782   :  { %v1226_v53 = vmul.f32 0.6931472, %v2131_v52 }
0x1784   :  { %v1227_v55 = vsub.f32 %v1219_v33, %v1226_v53 }
0x1786   :  { %1228 = vst [vmem:[#allocation4 + $0x5] sm:$0x1] %v1227_v55 }
0x17c7   :  { %v1618_v56 = vpop.xlane.xlu1 %1617 }
0x17c8   :  { %2132 = vlog2.f32 %v1618_v56 }
0x17d2   :  { %v2133_v57 = vpop.eup %2132 }
0x17d3   :  { %v1620_v58 = vmul.f32 0.6931472, %v2133_v57 }
0x17d5   :  { %v1621_v59 = vsub.f32 %v1613_v7, %v1620_v58 }
0x17d7   :  { %1622 = vst [vmem:[#allocation4 + $0x7] sm:$0x1] %v1621_v59 }
0x17d8   :  { %2179 = shalt.err (!%p2176_p3)
}
0x17d9   :  { %s2180_s28 = scalar_lea.hbm %s2585_s7, 128 }
0x17da   :  { %p2181_p4 = scmp.ne.s32.totalorder %s2585_s7, %s2180_s28  ;;  %p2184_p5 = scmp.lt.u32.totalorder %s2180_s28, %s2585_s7 }
0x17dc   :  { %p2186_p6 = pnand %p2184_p5, %p2181_p4 }
0x17de   :  { %2189 = shalt.err (!%p2186_p6)
}
0x17df   :  { %1635 = dma.vmem_to_hbm [thread:$0]  %s1633_s1, 128, %s2585_s7, [#allocation5]  }
0x17e0   :  { %2192 = dma.done.wait [#allocation5], 128  }
0x17e1   :  { %2193 = vsyncadd [#allocation5], 4294967168 }
0x17e2   :  { %2194 = dma.done.wait [#allocation7], 16  }
0x17e3   :  { %2195 = vsyncadd [#allocation7], 4294967280 }
0x17e4   :  { %1652 = vsyncpa [#allocation5], 1 }
0x17e5   :  { %1653 = vsyncpa [#allocation7], 1 }

</bundles_post_ra>
